<compile_context>
chip_gen: v7x
topology: tpu7x:2x2x1
jax: 0.10.0
libtpu: 0.0.40
codegen_flags: <defaults>
</compile_context>

<pallas_src>
import functools

import jax
import jax.numpy as jnp
from jax.experimental import pallas as pl
from jax.experimental.pallas import tpu as pltpu


# ----------------------------- fused Pallas kernel ---------------------------

def _fused_simclr_kernel(*refs, num_layers, inv_n):
    """Inputs: adj(+I), x, pool, [w1,b1,w2,b2,gamma,beta]*L, pw1,pb1,pw2,pb2 ; out y."""
    adj_ref, x_ref, pool_ref = refs[0], refs[1], refs[2]
    layer_refs = refs[3:3 + 6 * num_layers]
    pw1_ref, pb1_ref, pw2_ref, pb2_ref = refs[3 + 6 * num_layers: 7 + 6 * num_layers]
    o_ref = refs[7 + 6 * num_layers]

    adj = adj_ref[...]                      # (N, N)  bf16, self-loop folded in (A + I)
    pool = pool_ref[...]                    # (GP, N) bf16 graph-membership matrix
    h = x_ref[...]                          # (N, Dp) bf16
    pooled_blocks = []                      # per-layer (GP, HP) pooled embeddings (tiny)

    for l in range(num_layers):
        w1_ref, b1_ref, w2_ref, b2_ref, g_ref, bt_ref = layer_refs[6 * l: 6 * l + 6]

        # GIN aggregation: (1+eps)*x_i + sum_{j in N(i)} x_j, eps = 0  ==  (A+I) @ h
        agg = jnp.dot(adj, h, preferred_element_type=jnp.float32)

        # MLP: Linear -> ReLU -> Linear (bf16 MXU operands, f32 accumulate)
        h1 = jnp.dot(agg.astype(jnp.bfloat16), w1_ref[...],
                     preferred_element_type=jnp.float32) + b1_ref[...]
        h1 = jnp.maximum(h1, 0.0)
        h2 = jnp.dot(h1.astype(jnp.bfloat16), w2_ref[...],
                     preferred_element_type=jnp.float32) + b2_ref[...]

        # x = F.relu(conv(x)); x = BatchNorm1d(x) (train mode, batch stats).
        # BN folded into a single FMA over (N, HP); stats use the REAL node count.
        hr = jnp.maximum(h2, 0.0)
        mean = jnp.sum(hr, axis=0, keepdims=True) * inv_n           # (1, HP)
        meansq = jnp.sum(hr * hr, axis=0, keepdims=True) * inv_n    # (1, HP)
        var = jnp.maximum(meansq - mean * mean, 0.0)
        s = g_ref[...] * jax.lax.rsqrt(var + 1e-5)                  # (1, HP)
        t = bt_ref[...] - mean * s                                  # (1, HP)
        # TODO(synk): at realistic N compute the two column sums on the MXU
        #   (ones(1,N) @ [hr | hr*hr]) instead of VPU sublane reductions.
        hf = (hr * s + t).astype(jnp.bfloat16)                      # bf16 once

        # global_add_pool of THIS layer right away (node features die here).
        pooled_blocks.append(
            jnp.dot(pool, hf, preferred_element_type=jnp.float32))  # (GP, HP)
        h = hf                                                      # next layer input

    # Concatenate only the tiny pooled graph embeddings: (GP, L*HP).
    y = jnp.concatenate(pooled_blocks, axis=1)

    # proj_head: Linear -> ReLU -> Linear
    y = jnp.dot(y.astype(jnp.bfloat16), pw1_ref[...],
                preferred_element_type=jnp.float32) + pb1_ref[...]
    y = jnp.maximum(y, 0.0)
    y = jnp.dot(y.astype(jnp.bfloat16), pw2_ref[...],
                preferred_element_type=jnp.float32) + pb2_ref[...]
    o_ref[...] = y


# ------------------------------ Pallas wrapper --------------------------------

def _full_spec(shape):
    return pl.BlockSpec(shape, lambda i: tuple(0 for _ in shape))


def simclr_forward(padded_params, x_pad, adj_self, pool_pad, *,
                   num_layers, hidden_pad, real_dims):
    """Single fused pallas_call for the whole simclr forward (padded layout)."""
    inputs = [adj_self, x_pad, pool_pad]
    for layer in padded_params["gin_layers"]:
        inputs += [layer["w1"], layer["b1"], layer["w2"], layer["b2"],
                   layer["bn_gamma"], layer["bn_beta"]]
    inputs += [padded_params["proj_w1"], padded_params["proj_b1"],
               padded_params["proj_w2"], padded_params["proj_b2"]]

    n_nodes, n_feat, hidden, n_graphs = real_dims
    gp = pool_pad.shape[0]
    embp = hidden_pad * num_layers
    emb = hidden * num_layers

    # Advisory cost estimate based on REAL (unpadded) work.
    flops = 0
    for l in range(num_layers):
        din = n_feat if l == 0 else hidden
        flops += 2 * n_nodes * n_nodes * din                     # (A+I) @ h
        flops += 2 * n_nodes * din * hidden                      # MLP linear 1
        flops += 2 * n_nodes * hidden * hidden                   # MLP linear 2
        flops += 2 * n_graphs * n_nodes * hidden                 # per-layer pool
    flops += 2 * 2 * n_graphs * emb * emb                        # projection head
    bytes_accessed = (n_nodes * n_nodes + n_nodes * n_feat + n_graphs * n_nodes) * 4
    bytes_accessed += num_layers * (n_feat * hidden + hidden * hidden + 4 * hidden) * 4
    bytes_accessed += (2 * emb * emb + 2 * emb + n_graphs * emb) * 4

    kernel = functools.partial(_fused_simclr_kernel,
                               num_layers=num_layers, inv_n=1.0 / n_nodes)
    return pl.pallas_call(
        kernel,
        out_shape=jax.ShapeDtypeStruct((gp, embp), jnp.float32),
        grid=(1,),
        in_specs=[_full_spec(a.shape) for a in inputs],
        out_specs=_full_spec((gp, embp)),
        compiler_params=pltpu.CompilerParams(dimension_semantics=("arbitrary",)),
        cost_estimate=pl.CostEstimate(
            flops=int(flops),
            transcendentals=int(num_layers * hidden),
            bytes_accessed=int(bytes_accessed)),
    )(*inputs)


# ------------------------------ parameters ------------------------------------

def _xavier_uniform(key, fan_in, fan_out):
    bound = (6.0 / (fan_in + fan_out)) ** 0.5
    return jax.random.uniform(
        key, (fan_in, fan_out), jnp.float32, minval=-bound, maxval=bound)


def init_params(key, num_features, hidden_dim, num_gc_layers):
    """Real-size parameters (xavier-uniform weights, zero biases, BN gamma=1/beta=0)."""
    params = {"gin_layers": []}
    keys = jax.random.split(key, 2 * num_gc_layers + 2)
    for i in range(num_gc_layers):
        in_dim = num_features if i == 0 else hidden_dim
        params["gin_layers"].append({
            "w1": _xavier_uniform(keys[2 * i], in_dim, hidden_dim),
            "b1": jnp.zeros((hidden_dim,), jnp.float32),
            "w2": _xavier_uniform(keys[2 * i + 1], hidden_dim, hidden_dim),
            "b2": jnp.zeros((hidden_dim,), jnp.float32),
            "bn_gamma": jnp.ones((hidden_dim,), jnp.float32),
            "bn_beta": jnp.zeros((hidden_dim,), jnp.float32),
        })
    emb = hidden_dim * num_gc_layers
    params["proj_w1"] = _xavier_uniform(keys[-2], emb, emb)
    params["proj_b1"] = jnp.zeros((emb,), jnp.float32)
    params["proj_w2"] = _xavier_uniform(keys[-1], emb, emb)
    params["proj_b2"] = jnp.zeros((emb,), jnp.float32)
    return params


def pad_params(params, num_features, hidden_dim, num_gc_layers, feat_pad, hidden_pad):
    """Zero-pad params to lane-dense shapes; weights cast to bf16, bias/BN stay f32."""
    padded = {"gin_layers": []}
    for i, layer in enumerate(params["gin_layers"]):
        in_real = num_features if i == 0 else hidden_dim
        in_pad = feat_pad if i == 0 else hidden_pad
        w1 = jnp.zeros((in_pad, hidden_pad), jnp.float32).at[:in_real, :hidden_dim].set(layer["w1"])
        w2 = jnp.zeros((hidden_pad, hidden_pad), jnp.float32).at[:hidden_dim, :hidden_dim].set(layer["w2"])
        b1 = jnp.zeros((1, hidden_pad), jnp.float32).at[0, :hidden_dim].set(layer["b1"])
        b2 = jnp.zeros((1, hidden_pad), jnp.float32).at[0, :hidden_dim].set(layer["b2"])
        gm = jnp.zeros((1, hidden_pad), jnp.float32).at[0, :hidden_dim].set(layer["bn_gamma"])
        bt = jnp.zeros((1, hidden_pad), jnp.float32).at[0, :hidden_dim].set(layer["bn_beta"])
        padded["gin_layers"].append({
            "w1": w1.astype(jnp.bfloat16), "b1": b1,
            "w2": w2.astype(jnp.bfloat16), "b2": b2,
            "bn_gamma": gm, "bn_beta": bt,
        })
    emb = hidden_dim * num_gc_layers
    embp = hidden_pad * num_gc_layers
    # Pooled-embedding layout in the kernel is [layer0 padded block | layer1 padded
    # block | ...], so scatter each layer's real rows into its padded block of proj_w1.
    pw1 = jnp.zeros((embp, embp), jnp.float32)
    for l in range(num_gc_layers):
        pw1 = pw1.at[l * hidden_pad: l * hidden_pad + hidden_dim, :emb].set(
            params["proj_w1"][l * hidden_dim:(l + 1) * hidden_dim, :])
    pw2 = jnp.zeros((embp, embp), jnp.float32).at[:emb, :emb].set(params["proj_w2"])
    padded["proj_w1"] = pw1.astype(jnp.bfloat16)
    padded["proj_b1"] = jnp.zeros((1, embp), jnp.float32).at[0, :emb].set(params["proj_b1"])
    padded["proj_w2"] = pw2.astype(jnp.bfloat16)
    padded["proj_b2"] = jnp.zeros((1, embp), jnp.float32).at[0, :emb].set(params["proj_b2"])
    return padded


# ----------------------------- pure-JAX reference ------------------------------

def reference_forward(params, x, adj_self, pool, num_layers):
    """Unpadded f32 reference of the same forward math (for tolerance check)."""
    h = x
    pooled = []
    for l in range(num_layers):
        layer = params["gin_layers"][l]
        agg = adj_self @ h
        h1 = jnp.maximum(agg @ layer["w1"] + layer["b1"], 0.0)
        h2 = h1 @ layer["w2"] + layer["b2"]
        hr = jnp.maximum(h2, 0.0)
        mean = jnp.mean(hr, axis=0, keepdims=True)
        var = jnp.mean(jnp.square(hr - mean), axis=0, keepdims=True)
        hf = (hr - mean) * jax.lax.rsqrt(var + 1e-5) * layer["bn_gamma"] + layer["bn_beta"]
        pooled.append(pool @ hf)
        h = hf
    y = jnp.concatenate(pooled, axis=1)
    y = jnp.maximum(y @ params["proj_w1"] + params["proj_b1"], 0.0)
    y = y @ params["proj_w2"] + params["proj_b2"]
    return y


# ----------------------------------- main --------------------------------------

if __name__ == "__main__":
    key = jax.random.PRNGKey(0)
    kx, kp = jax.random.split(key)

    N, F, H, L, G = 16, 8, 32, 2, 2          # nodes, features, hidden, layers, graphs
    NODES_PER_GRAPH = N // G
    FP, HP, GP = 128, 128, 8                 # lane-dense feature/hidden pads, sublane graph pad

    # Node features.
    x = jax.random.normal(kx, (N, F), dtype=jnp.float32)

    # batch[n] = graph id of node n.
    batch = jnp.repeat(jnp.arange(G, dtype=jnp.int32), NODES_PER_GRAPH)

    # edge_index (2, E): directed ring in both directions inside each graph.
    src, dst = [], []
    for g in range(G):
        base = g * NODES_PER_GRAPH
        for i in range(NODES_PER_GRAPH):
            s = base + i
            t = base + (i + 1) % NODES_PER_GRAPH
            src += [s, t]
            dst += [t, s]
    edge_index = jnp.array([src, dst], dtype=jnp.int32)

    # Dense adjacency with the GIN self term folded in: (A + I) -> one matmul.
    adj = jnp.zeros((N, N), jnp.float32).at[edge_index[1], edge_index[0]].add(1.0)
    adj_self_f32 = adj + jnp.eye(N, dtype=jnp.float32)
    adj_self = adj_self_f32.astype(jnp.bfloat16)

    # Pooling matrix P[g, n] = 1 iff node n in graph g; rows padded to GP.
    pool = (batch[None, :] == jnp.arange(G)[:, None]).astype(jnp.float32)
    pool_pad = jnp.zeros((GP, N), jnp.float32).at[:G].set(pool).astype(jnp.bfloat16)

    # Zero-pad node features to a lane-dense width.
    x_pad = jnp.zeros((N, FP), jnp.float32).at[:, :F].set(x).astype(jnp.bfloat16)

    params = init_params(kp, F, H, L)
    pparams = pad_params(params, F, H, L, FP, HP)

    y_pad = simclr_forward(pparams, x_pad, adj_self, pool_pad,
                           num_layers=L, hidden_pad=HP, real_dims=(N, F, H, G))
    y = y_pad[:G, :H * L]                    # strip padding -> (G, hidden*L)
    y = jax.block_until_ready(y)
    assert y.shape == (G, H * L) and y.dtype == jnp.float32

    # Tolerance check vs. f32 reference (bf16 MXU-operand rounding accumulates).
    y_ref = reference_forward(params, x, adj_self_f32, pool, L)
    rel_err = float(jnp.max(jnp.abs(y - y_ref)) / (jnp.max(jnp.abs(y_ref)) + 1e-6))
    assert rel_err < 0.15, f"kernel/reference mismatch: rel_err={rel_err}"

    print("KERNEL_OK")
</pallas_src>

<mosaic_0001>
module attributes {stable_mosaic.version = 11 : i64} {
  func.func @_fused_simclr_kernel(%arg0: i32, %arg1: memref<16x16xbf16, #tpu.memory_space<vmem>>, %arg2: memref<16x128xbf16, #tpu.memory_space<vmem>>, %arg3: memref<8x16xbf16, #tpu.memory_space<vmem>>, %arg4: memref<128x128xbf16, #tpu.memory_space<vmem>>, %arg5: memref<1x128xf32, #tpu.memory_space<vmem>>, %arg6: memref<128x128xbf16, #tpu.memory_space<vmem>>, %arg7: memref<1x128xf32, #tpu.memory_space<vmem>>, %arg8: memref<1x128xf32, #tpu.memory_space<vmem>>, %arg9: memref<1x128xf32, #tpu.memory_space<vmem>>, %arg10: memref<128x128xbf16, #tpu.memory_space<vmem>>, %arg11: memref<1x128xf32, #tpu.memory_space<vmem>>, %arg12: memref<128x128xbf16, #tpu.memory_space<vmem>>, %arg13: memref<1x128xf32, #tpu.memory_space<vmem>>, %arg14: memref<1x128xf32, #tpu.memory_space<vmem>>, %arg15: memref<1x128xf32, #tpu.memory_space<vmem>>, %arg16: memref<256x256xbf16, #tpu.memory_space<vmem>>, %arg17: memref<1x256xf32, #tpu.memory_space<vmem>>, %arg18: memref<256x256xbf16, #tpu.memory_space<vmem>>, %arg19: memref<1x256xf32, #tpu.memory_space<vmem>>, %arg20: memref<8x256xf32, #tpu.memory_space<vmem>>) attributes {dimension_semantics = [#tpu.dimension_semantics<arbitrary>], iteration_bounds = array<i64: 1>, scalar_prefetch = 0 : i64, scratch_operands = 0 : i64, tpu.core_type = #tpu.core_type<tc>, window_params = [{pipeline_mode = #tpu.pipeline_mode<synchronous>, transform_indices = @transform_0, window_bounds = array<i64: 16, 16>}, {pipeline_mode = #tpu.pipeline_mode<synchronous>, transform_indices = @transform_1, window_bounds = array<i64: 16, 128>}, {pipeline_mode = #tpu.pipeline_mode<synchronous>, transform_indices = @transform_2, window_bounds = array<i64: 8, 16>}, {pipeline_mode = #tpu.pipeline_mode<synchronous>, transform_indices = @transform_3, window_bounds = array<i64: 128, 128>}, {pipeline_mode = #tpu.pipeline_mode<synchronous>, transform_indices = @transform_4, window_bounds = array<i64: 1, 128>}, {pipeline_mode = #tpu.pipeline_mode<synchronous>, transform_indices = @transform_5, window_bounds = array<i64: 128, 128>}, {pipeline_mode = #tpu.pipeline_mode<synchronous>, transform_indices = @transform_6, window_bounds = array<i64: 1, 128>}, {pipeline_mode = #tpu.pipeline_mode<synchronous>, transform_indices = @transform_7, window_bounds = array<i64: 1, 128>}, {pipeline_mode = #tpu.pipeline_mode<synchronous>, transform_indices = @transform_8, window_bounds = array<i64: 1, 128>}, {pipeline_mode = #tpu.pipeline_mode<synchronous>, transform_indices = @transform_9, window_bounds = array<i64: 128, 128>}, {pipeline_mode = #tpu.pipeline_mode<synchronous>, transform_indices = @transform_10, window_bounds = array<i64: 1, 128>}, {pipeline_mode = #tpu.pipeline_mode<synchronous>, transform_indices = @transform_11, window_bounds = array<i64: 128, 128>}, {pipeline_mode = #tpu.pipeline_mode<synchronous>, transform_indices = @transform_12, window_bounds = array<i64: 1, 128>}, {pipeline_mode = #tpu.pipeline_mode<synchronous>, transform_indices = @transform_13, window_bounds = array<i64: 1, 128>}, {pipeline_mode = #tpu.pipeline_mode<synchronous>, transform_indices = @transform_14, window_bounds = array<i64: 1, 128>}, {pipeline_mode = #tpu.pipeline_mode<synchronous>, transform_indices = @transform_15, window_bounds = array<i64: 256, 256>}, {pipeline_mode = #tpu.pipeline_mode<synchronous>, transform_indices = @transform_16, window_bounds = array<i64: 1, 256>}, {pipeline_mode = #tpu.pipeline_mode<synchronous>, transform_indices = @transform_17, window_bounds = array<i64: 256, 256>}, {pipeline_mode = #tpu.pipeline_mode<synchronous>, transform_indices = @transform_18, window_bounds = array<i64: 1, 256>}, {pipeline_mode = #tpu.pipeline_mode<synchronous>, transform_indices = @transform_19, window_bounds = array<i64: 8, 256>}]} {
    %c0 = arith.constant 0 : index
    %c0_0 = arith.constant 0 : index
    %0 = vector.load %arg1[%c0, %c0_0] : memref<16x16xbf16, #tpu.memory_space<vmem>>, vector<16x16xbf16>
    %c0_1 = arith.constant 0 : index
    %c0_2 = arith.constant 0 : index
    %1 = vector.load %arg3[%c0_1, %c0_2] : memref<8x16xbf16, #tpu.memory_space<vmem>>, vector<8x16xbf16>
    %c0_3 = arith.constant 0 : index
    %c0_4 = arith.constant 0 : index
    %2 = vector.load %arg2[%c0_3, %c0_4] : memref<16x128xbf16, #tpu.memory_space<vmem>>, vector<16x128xbf16>
    %cst = arith.constant dense<0.000000e+00> : vector<16x128xf32>
    %3 = tpu.matmul %0, %2, %cst {dimension_numbers = #tpu.dot_dimension_numbers<[1], [0], [0], [1], [0, 0, 1, 1], [], []>} : vector<16x16xbf16>, vector<16x128xbf16>, vector<16x128xf32> -> vector<16x128xf32>
    %4 = arith.truncf %3 : vector<16x128xf32> to vector<16x128xbf16>
    %c0_5 = arith.constant 0 : index
    %c0_6 = arith.constant 0 : index
    %5 = vector.load %arg4[%c0_5, %c0_6] : memref<128x128xbf16, #tpu.memory_space<vmem>>, vector<128x128xbf16>
    %cst_7 = arith.constant dense<0.000000e+00> : vector<16x128xf32>
    %6 = tpu.matmul %4, %5, %cst_7 {dimension_numbers = #tpu.dot_dimension_numbers<[1], [0], [0], [1], [0, 0, 1, 1], [], []>} : vector<16x128xbf16>, vector<128x128xbf16>, vector<16x128xf32> -> vector<16x128xf32>
    %c0_8 = arith.constant 0 : index
    %c0_9 = arith.constant 0 : index
    %7 = vector.load %arg5[%c0_8, %c0_9] : memref<1x128xf32, #tpu.memory_space<vmem>>, vector<1x128xf32>
    %8 = vector.broadcast %7 : vector<1x128xf32> to vector<16x128xf32>
    %9 = arith.addf %6, %8 : vector<16x128xf32>
    %cst_10 = arith.constant 0.000000e+00 : f32
    %10 = vector.broadcast %cst_10 : f32 to vector<16x128xf32>
    %11 = arith.maximumf %9, %10 : vector<16x128xf32>
    %12 = arith.truncf %11 : vector<16x128xf32> to vector<16x128xbf16>
    %c0_11 = arith.constant 0 : index
    %c0_12 = arith.constant 0 : index
    %13 = vector.load %arg6[%c0_11, %c0_12] : memref<128x128xbf16, #tpu.memory_space<vmem>>, vector<128x128xbf16>
    %cst_13 = arith.constant dense<0.000000e+00> : vector<16x128xf32>
    %14 = tpu.matmul %12, %13, %cst_13 {dimension_numbers = #tpu.dot_dimension_numbers<[1], [0], [0], [1], [0, 0, 1, 1], [], []>} : vector<16x128xbf16>, vector<128x128xbf16>, vector<16x128xf32> -> vector<16x128xf32>
    %c0_14 = arith.constant 0 : index
    %c0_15 = arith.constant 0 : index
    %15 = vector.load %arg7[%c0_14, %c0_15] : memref<1x128xf32, #tpu.memory_space<vmem>>, vector<1x128xf32>
    %16 = vector.broadcast %15 : vector<1x128xf32> to vector<16x128xf32>
    %17 = arith.addf %14, %16 : vector<16x128xf32>
    %cst_16 = arith.constant 0.000000e+00 : f32
    %18 = vector.broadcast %cst_16 : f32 to vector<16x128xf32>
    %19 = arith.maximumf %17, %18 : vector<16x128xf32>
    %cst_17 = arith.constant dense<0.000000e+00> : vector<128xf32>
    %20 = vector.multi_reduction <add>, %19, %cst_17 [0] : vector<16x128xf32> to vector<128xf32>
    %21 = vector.shape_cast %20 : vector<128xf32> to vector<1x128xf32>
    %cst_18 = arith.constant 6.250000e-02 : f32
    %22 = vector.broadcast %cst_18 : f32 to vector<1x128xf32>
    %23 = arith.mulf %21, %22 : vector<1x128xf32>
    %24 = arith.mulf %19, %19 : vector<16x128xf32>
    %cst_19 = arith.constant dense<0.000000e+00> : vector<128xf32>
    %25 = vector.multi_reduction <add>, %24, %cst_19 [0] : vector<16x128xf32> to vector<128xf32>
    %26 = vector.shape_cast %25 : vector<128xf32> to vector<1x128xf32>
    %cst_20 = arith.constant 6.250000e-02 : f32
    %27 = vector.broadcast %cst_20 : f32 to vector<1x128xf32>
    %28 = arith.mulf %26, %27 : vector<1x128xf32>
    %29 = arith.mulf %23, %23 : vector<1x128xf32>
    %30 = arith.subf %28, %29 : vector<1x128xf32>
    %cst_21 = arith.constant 0.000000e+00 : f32
    %31 = vector.broadcast %cst_21 : f32 to vector<1x128xf32>
    %32 = arith.maximumf %30, %31 : vector<1x128xf32>
    %c0_22 = arith.constant 0 : index
    %c0_23 = arith.constant 0 : index
    %33 = vector.load %arg8[%c0_22, %c0_23] : memref<1x128xf32, #tpu.memory_space<vmem>>, vector<1x128xf32>
    %cst_24 = arith.constant 9.99999974E-6 : f32
    %34 = vector.broadcast %cst_24 : f32 to vector<1x128xf32>
    %35 = arith.addf %32, %34 : vector<1x128xf32>
    %36 = math.rsqrt %35 : vector<1x128xf32>
    %37 = arith.mulf %33, %36 : vector<1x128xf32>
    %c0_25 = arith.constant 0 : index
    %c0_26 = arith.constant 0 : index
    %38 = vector.load %arg9[%c0_25, %c0_26] : memref<1x128xf32, #tpu.memory_space<vmem>>, vector<1x128xf32>
    %39 = arith.mulf %23, %37 : vector<1x128xf32>
    %40 = arith.subf %38, %39 : vector<1x128xf32>
    %41 = vector.broadcast %37 : vector<1x128xf32> to vector<16x128xf32>
    %42 = arith.mulf %19, %41 : vector<16x128xf32>
    %43 = vector.broadcast %40 : vector<1x128xf32> to vector<16x128xf32>
    %44 = arith.addf %42, %43 : vector<16x128xf32>
    %45 = arith.truncf %44 : vector<16x128xf32> to vector<16x128xbf16>
    %cst_27 = arith.constant dense<0.000000e+00> : vector<8x128xf32>
    %46 = tpu.matmul %1, %45, %cst_27 {dimension_numbers = #tpu.dot_dimension_numbers<[1], [0], [0], [1], [0, 0, 1, 1], [], []>} : vector<8x16xbf16>, vector<16x128xbf16>, vector<8x128xf32> -> vector<8x128xf32>
    %cst_28 = arith.constant dense<0.000000e+00> : vector<16x128xf32>
    %47 = tpu.matmul %0, %45, %cst_28 {dimension_numbers = #tpu.dot_dimension_numbers<[1], [0], [0], [1], [0, 0, 1, 1], [], []>} : vector<16x16xbf16>, vector<16x128xbf16>, vector<16x128xf32> -> vector<16x128xf32>
    %48 = arith.truncf %47 : vector<16x128xf32> to vector<16x128xbf16>
    %c0_29 = arith.constant 0 : index
    %c0_30 = arith.constant 0 : index
    %49 = vector.load %arg10[%c0_29, %c0_30] : memref<128x128xbf16, #tpu.memory_space<vmem>>, vector<128x128xbf16>
    %cst_31 = arith.constant dense<0.000000e+00> : vector<16x128xf32>
    %50 = tpu.matmul %48, %49, %cst_31 {dimension_numbers = #tpu.dot_dimension_numbers<[1], [0], [0], [1], [0, 0, 1, 1], [], []>} : vector<16x128xbf16>, vector<128x128xbf16>, vector<16x128xf32> -> vector<16x128xf32>
    %c0_32 = arith.constant 0 : index
    %c0_33 = arith.constant 0 : index
    %51 = vector.load %arg11[%c0_32, %c0_33] : memref<1x128xf32, #tpu.memory_space<vmem>>, vector<1x128xf32>
    %52 = vector.broadcast %51 : vector<1x128xf32> to vector<16x128xf32>
    %53 = arith.addf %50, %52 : vector<16x128xf32>
    %cst_34 = arith.constant 0.000000e+00 : f32
    %54 = vector.broadcast %cst_34 : f32 to vector<16x128xf32>
    %55 = arith.maximumf %53, %54 : vector<16x128xf32>
    %56 = arith.truncf %55 : vector<16x128xf32> to vector<16x128xbf16>
    %c0_35 = arith.constant 0 : index
    %c0_36 = arith.constant 0 : index
    %57 = vector.load %arg12[%c0_35, %c0_36] : memref<128x128xbf16, #tpu.memory_space<vmem>>, vector<128x128xbf16>
    %cst_37 = arith.constant dense<0.000000e+00> : vector<16x128xf32>
    %58 = tpu.matmul %56, %57, %cst_37 {dimension_numbers = #tpu.dot_dimension_numbers<[1], [0], [0], [1], [0, 0, 1, 1], [], []>} : vector<16x128xbf16>, vector<128x128xbf16>, vector<16x128xf32> -> vector<16x128xf32>
    %c0_38 = arith.constant 0 : index
    %c0_39 = arith.constant 0 : index
    %59 = vector.load %arg13[%c0_38, %c0_39] : memref<1x128xf32, #tpu.memory_space<vmem>>, vector<1x128xf32>
    %60 = vector.broadcast %59 : vector<1x128xf32> to vector<16x128xf32>
    %61 = arith.addf %58, %60 : vector<16x128xf32>
    %cst_40 = arith.constant 0.000000e+00 : f32
    %62 = vector.broadcast %cst_40 : f32 to vector<16x128xf32>
    %63 = arith.maximumf %61, %62 : vector<16x128xf32>
    %cst_41 = arith.constant dense<0.000000e+00> : vector<128xf32>
    %64 = vector.multi_reduction <add>, %63, %cst_41 [0] : vector<16x128xf32> to vector<128xf32>
    %65 = vector.shape_cast %64 : vector<128xf32> to vector<1x128xf32>
    %cst_42 = arith.constant 6.250000e-02 : f32
    %66 = vector.broadcast %cst_42 : f32 to vector<1x128xf32>
    %67 = arith.mulf %65, %66 : vector<1x128xf32>
    %68 = arith.mulf %63, %63 : vector<16x128xf32>
    %cst_43 = arith.constant dense<0.000000e+00> : vector<128xf32>
    %69 = vector.multi_reduction <add>, %68, %cst_43 [0] : vector<16x128xf32> to vector<128xf32>
    %70 = vector.shape_cast %69 : vector<128xf32> to vector<1x128xf32>
    %cst_44 = arith.constant 6.250000e-02 : f32
    %71 = vector.broadcast %cst_44 : f32 to vector<1x128xf32>
    %72 = arith.mulf %70, %71 : vector<1x128xf32>
    %73 = arith.mulf %67, %67 : vector<1x128xf32>
    %74 = arith.subf %72, %73 : vector<1x128xf32>
    %cst_45 = arith.constant 0.000000e+00 : f32
    %75 = vector.broadcast %cst_45 : f32 to vector<1x128xf32>
    %76 = arith.maximumf %74, %75 : vector<1x128xf32>
    %c0_46 = arith.constant 0 : index
    %c0_47 = arith.constant 0 : index
    %77 = vector.load %arg14[%c0_46, %c0_47] : memref<1x128xf32, #tpu.memory_space<vmem>>, vector<1x128xf32>
    %cst_48 = arith.constant 9.99999974E-6 : f32
    %78 = vector.broadcast %cst_48 : f32 to vector<1x128xf32>
    %79 = arith.addf %76, %78 : vector<1x128xf32>
    %80 = math.rsqrt %79 : vector<1x128xf32>
    %81 = arith.mulf %77, %80 : vector<1x128xf32>
    %c0_49 = arith.constant 0 : index
    %c0_50 = arith.constant 0 : index
    %82 = vector.load %arg15[%c0_49, %c0_50] : memref<1x128xf32, #tpu.memory_space<vmem>>, vector<1x128xf32>
    %83 = arith.mulf %67, %81 : vector<1x128xf32>
    %84 = arith.subf %82, %83 : vector<1x128xf32>
    %85 = vector.broadcast %81 : vector<1x128xf32> to vector<16x128xf32>
    %86 = arith.mulf %63, %85 : vector<16x128xf32>
    %87 = vector.broadcast %84 : vector<1x128xf32> to vector<16x128xf32>
    %88 = arith.addf %86, %87 : vector<16x128xf32>
    %89 = arith.truncf %88 : vector<16x128xf32> to vector<16x128xbf16>
    %cst_51 = arith.constant dense<0.000000e+00> : vector<8x128xf32>
    %90 = tpu.matmul %1, %89, %cst_51 {dimension_numbers = #tpu.dot_dimension_numbers<[1], [0], [0], [1], [0, 0, 1, 1], [], []>} : vector<8x16xbf16>, vector<16x128xbf16>, vector<8x128xf32> -> vector<8x128xf32>
    %91 = tpu.concatenate %46, %90 in 1 : vector<8x128xf32>, vector<8x128xf32> -> vector<8x256xf32>
    %92 = arith.truncf %91 : vector<8x256xf32> to vector<8x256xbf16>
    %c0_52 = arith.constant 0 : index
    %c0_53 = arith.constant 0 : index
    %93 = vector.load %arg16[%c0_52, %c0_53] : memref<256x256xbf16, #tpu.memory_space<vmem>>, vector<256x256xbf16>
    %cst_54 = arith.constant dense<0.000000e+00> : vector<8x256xf32>
    %94 = tpu.matmul %92, %93, %cst_54 {dimension_numbers = #tpu.dot_dimension_numbers<[1], [0], [0], [1], [0, 0, 1, 1], [], []>} : vector<8x256xbf16>, vector<256x256xbf16>, vector<8x256xf32> -> vector<8x256xf32>
    %c0_55 = arith.constant 0 : index
    %c0_56 = arith.constant 0 : index
    %95 = vector.load %arg17[%c0_55, %c0_56] : memref<1x256xf32, #tpu.memory_space<vmem>>, vector<1x256xf32>
    %96 = vector.broadcast %95 : vector<1x256xf32> to vector<8x256xf32>
    %97 = arith.addf %94, %96 : vector<8x256xf32>
    %cst_57 = arith.constant 0.000000e+00 : f32
    %98 = vector.broadcast %cst_57 : f32 to vector<8x256xf32>
    %99 = arith.maximumf %97, %98 : vector<8x256xf32>
    %100 = arith.truncf %99 : vector<8x256xf32> to vector<8x256xbf16>
    %c0_58 = arith.constant 0 : index
    %c0_59 = arith.constant 0 : index
    %101 = vector.load %arg18[%c0_58, %c0_59] : memref<256x256xbf16, #tpu.memory_space<vmem>>, vector<256x256xbf16>
    %cst_60 = arith.constant dense<0.000000e+00> : vector<8x256xf32>
    %102 = tpu.matmul %100, %101, %cst_60 {dimension_numbers = #tpu.dot_dimension_numbers<[1], [0], [0], [1], [0, 0, 1, 1], [], []>} : vector<8x256xbf16>, vector<256x256xbf16>, vector<8x256xf32> -> vector<8x256xf32>
    %c0_61 = arith.constant 0 : index
    %c0_62 = arith.constant 0 : index
    %103 = vector.load %arg19[%c0_61, %c0_62] : memref<1x256xf32, #tpu.memory_space<vmem>>, vector<1x256xf32>
    %104 = vector.broadcast %103 : vector<1x256xf32> to vector<8x256xf32>
    %105 = arith.addf %102, %104 : vector<8x256xf32>
    %c0_63 = arith.constant 0 : index
    %c0_64 = arith.constant 0 : index
    %106 = vector.load %arg20[%c0_63, %c0_64] : memref<8x256xf32, #tpu.memory_space<vmem>>, vector<8x256xf32>
    tpu.vector_store %arg20[%c0_63, %c0_64], %105 {strides = array<i32>} : memref<8x256xf32, #tpu.memory_space<vmem>>, vector<8x256xf32>,
    return
  }
  func.func @transform_0(%arg0: i32) -> (i32, i32) {
    %c0_i32 = arith.constant 0 : i32
    %c0_i32_0 = arith.constant 0 : i32
    %c0_i32_1 = arith.constant 0 : i32
    return %c0_i32, %c0_i32_0 : i32, i32
  }
  func.func @transform_1(%arg0: i32) -> (i32, i32) {
    %c0_i32 = arith.constant 0 : i32
    %c0_i32_0 = arith.constant 0 : i32
    %c0_i32_1 = arith.constant 0 : i32
    return %c0_i32, %c0_i32_0 : i32, i32
  }
  func.func @transform_2(%arg0: i32) -> (i32, i32) {
    %c0_i32 = arith.constant 0 : i32
    %c0_i32_0 = arith.constant 0 : i32
    %c0_i32_1 = arith.constant 0 : i32
    return %c0_i32, %c0_i32_0 : i32, i32
  }
  func.func @transform_3(%arg0: i32) -> (i32, i32) {
    %c0_i32 = arith.constant 0 : i32
    %c0_i32_0 = arith.constant 0 : i32
    %c0_i32_1 = arith.constant 0 : i32
    return %c0_i32, %c0_i32_0 : i32, i32
  }
  func.func @transform_4(%arg0: i32) -> (i32, i32) {
    %c0_i32 = arith.constant 0 : i32
    %c0_i32_0 = arith.constant 0 : i32
    %c0_i32_1 = arith.constant 0 : i32
    return %c0_i32, %c0_i32_0 : i32, i32
  }
  func.func @transform_5(%arg0: i32) -> (i32, i32) {
    %c0_i32 = arith.constant 0 : i32
    %c0_i32_0 = arith.constant 0 : i32
    %c0_i32_1 = arith.constant 0 : i32
    return %c0_i32, %c0_i32_0 : i32, i32
  }
  func.func @transform_6(%arg0: i32) -> (i32, i32) {
    %c0_i32 = arith.constant 0 : i32
    %c0_i32_0 = arith.constant 0 : i32
    %c0_i32_1 = arith.constant 0 : i32
    return %c0_i32, %c0_i32_0 : i32, i32
  }
  func.func @transform_7(%arg0: i32) -> (i32, i32) {
    %c0_i32 = arith.constant 0 : i32
    %c0_i32_0 = arith.constant 0 : i32
    %c0_i32_1 = arith.constant 0 : i32
    return %c0_i32, %c0_i32_0 : i32, i32
  }
  func.func @transform_8(%arg0: i32) -> (i32, i32) {
    %c0_i32 = arith.constant 0 : i32
    %c0_i32_0 = arith.constant 0 : i32
    %c0_i32_1 = arith.constant 0 : i32
    return %c0_i32, %c0_i32_0 : i32, i32
  }
  func.func @transform_9(%arg0: i32) -> (i32, i32) {
    %c0_i32 = arith.constant 0 : i32
    %c0_i32_0 = arith.constant 0 : i32
    %c0_i32_1 = arith.constant 0 : i32
    return %c0_i32, %c0_i32_0 : i32, i32
  }
  func.func @transform_10(%arg0: i32) -> (i32, i32) {
    %c0_i32 = arith.constant 0 : i32
    %c0_i32_0 = arith.constant 0 : i32
    %c0_i32_1 = arith.constant 0 : i32
    return %c0_i32, %c0_i32_0 : i32, i32
  }
  func.func @transform_11(%arg0: i32) -> (i32, i32) {
    %c0_i32 = arith.constant 0 : i32
    %c0_i32_0 = arith.constant 0 : i32
    %c0_i32_1 = arith.constant 0 : i32
    return %c0_i32, %c0_i32_0 : i32, i32
  }
  func.func @transform_12(%arg0: i32) -> (i32, i32) {
    %c0_i32 = arith.constant 0 : i32
    %c0_i32_0 = arith.constant 0 : i32
    %c0_i32_1 = arith.constant 0 : i32
    return %c0_i32, %c0_i32_0 : i32, i32
  }
  func.func @transform_13(%arg0: i32) -> (i32, i32) {
    %c0_i32 = arith.constant 0 : i32
    %c0_i32_0 = arith.constant 0 : i32
    %c0_i32_1 = arith.constant 0 : i32
    return %c0_i32, %c0_i32_0 : i32, i32
  }
  func.func @transform_14(%arg0: i32) -> (i32, i32) {
    %c0_i32 = arith.constant 0 : i32
    %c0_i32_0 = arith.constant 0 : i32
    %c0_i32_1 = arith.constant 0 : i32
    return %c0_i32, %c0_i32_0 : i32, i32
  }
  func.func @transform_15(%arg0: i32) -> (i32, i32) {
    %c0_i32 = arith.constant 0 : i32
    %c0_i32_0 = arith.constant 0 : i32
    %c0_i32_1 = arith.constant 0 : i32
    return %c0_i32, %c0_i32_0 : i32, i32
  }
  func.func @transform_16(%arg0: i32) -> (i32, i32) {
    %c0_i32 = arith.constant 0 : i32
    %c0_i32_0 = arith.constant 0 : i32
    %c0_i32_1 = arith.constant 0 : i32
    return %c0_i32, %c0_i32_0 : i32, i32
  }
  func.func @transform_17(%arg0: i32) -> (i32, i32) {
    %c0_i32 = arith.constant 0 : i32
    %c0_i32_0 = arith.constant 0 : i32
    %c0_i32_1 = arith.constant 0 : i32
    return %c0_i32, %c0_i32_0 : i32, i32
  }
  func.func @transform_18(%arg0: i32) -> (i32, i32) {
    %c0_i32 = arith.constant 0 : i32
    %c0_i32_0 = arith.constant 0 : i32
    %c0_i32_1 = arith.constant 0 : i32
    return %c0_i32, %c0_i32_0 : i32, i32
  }
  func.func @transform_19(%arg0: i32) -> (i32, i32) {
    %c0_i32 = arith.constant 0 : i32
    %c0_i32_0 = arith.constant 0 : i32
    %c0_i32_1 = arith.constant 0 : i32
    return %c0_i32, %c0_i32_0 : i32, i32
  }
}

</mosaic_0001>

<bundles_post_ra>
// kernel: tpu_custom_call.1
= control target key start
LH: loop header
LB: loop body
LE: loop exit
PB: predicated region body
PF: predicated region fallthrough
CT: control target
= control target key end

     0   :  { %s2413_s0 = inlined_call_operand.hbm [shape: bf16[16,16], index: 0, kind: input, shape index: {}]   ;;  %s2414_s1 = inlined_call_operand.hbm [shape: bf16[16,128], index: 1, kind: input, shape index: {}]   ;;  %s2415_s2 = inlined_call_operand.vmem [shape: bf16[8,16], index: 2, kind: input, shape index: {}]   ;;  %s2416_s3 = inlined_call_operand.hbm [shape: bf16[128,128], index: 3, kind: input, shape index: {}]   ;;  %s2417_s4 = inlined_call_operand.vmem [shape: f32[1,128], index: 4, kind: input, shape index: {}]   ;;  %s2418_s5 = inlined_call_operand.hbm [shape: bf16[128,128], index: 5, kind: input, shape index: {}]   ;;  %s2419_s6 = inlined_call_operand.vmem [shape: f32[1,128], index: 6, kind: input, shape index: {}]   ;;  %s2420_s7 = inlined_call_operand.vmem [shape: f32[1,128], index: 7, kind: input, shape index: {}]   ;;  %s2421_s8 = inlined_call_operand.vmem [shape: f32[1,128], index: 8, kind: input, shape index: {}]   ;;  %s2422_s9 = inlined_call_operand.hbm [shape: bf16[128,128], index: 9, kind: input, shape index: {}]   ;;  %s2423_s10 = inlined_call_operand.vmem [shape: f32[1,128], index: 10, kind: input, shape index: {}]   ;;  %s2424_s11 = inlined_call_operand.hbm [shape: bf16[128,128], index: 11, kind: input, shape index: {}]   ;;  %s2425_s12 = inlined_call_operand.vmem [shape: f32[1,128], index: 12, kind: input, shape index: {}]   ;;  %s2426_s13 = inlined_call_operand.vmem [shape: f32[1,128], index: 13, kind: input, shape index: {}]   ;;  %s2427_s14 = inlined_call_operand.vmem [shape: f32[1,128], index: 14, kind: input, shape index: {}]   ;;  %s2428_s15 = inlined_call_operand.hbm [shape: bf16[256,256], index: 15, kind: input, shape index: {}]   ;;  %s2429_s16 = inlined_call_operand.vmem [shape: f32[1,256], index: 16, kind: input, shape index: {}]   ;;  %s2430_s17 = inlined_call_operand.hbm [shape: bf16[256,256], index: 17, kind: input, shape index: {}]   ;;  %s2431_s18 = inlined_call_operand.vmem [shape: f32[1,256], index: 18, kind: input, shape index: {}]   ;;  %s2432_s19 = inlined_call_operand.hbm [shape: f32[8,256], index: 19, kind: output, shape index: {}]  }
   0x1   :  { %2437 = sst [smem:[#allocation23_spill]] %s2413_s0 }
   0x2   :  { %2438 = sst [smem:[#allocation24_spill]] %s2414_s1 }
   0x3   :  { %2439 = sst [smem:[#allocation25_spill]] %s2415_s2 }
   0x4   :  { %2440 = sst [smem:[#allocation26_spill]] %s2416_s3 }
   0x5   :  { %2441 = sst [smem:[#allocation27_spill]] %s2432_s19 }
   0x6   :  { %24 = vsyncpa [#allocation3], 0 }
   0x7   :  { %25 = vsyncpa [#allocation6], 0 }
   0x8   :  { %26 = vsyncpa [#allocation9], 0 }
   0x9   :  { %27 = vsyncpa [#allocation12], 0 }
   0xa   :  { %28 = vsyncpa [#allocation15], 0 }
   0xb   :  { %29 = vsyncpa [#allocation4], 0  ;;  %s2038_s0 = smov [#allocation5]   ;;  %s2039_s20 = smov [#allocation8]  }
   0xc   :  { %s47_s30 = sshll.u32 %s2038_s0, 4  ;;  %s75_s21 = sshll.u32 %s2039_s20, 4  ;;  %s48_s30 = int_to_ptr.vmem [resolvable:$true] %s47_s30  ;;  %s2153_s21 = int_to_ptr.vmem [resolvable:$true] %s75_s21 }
   0xd   :  { %s2442_s2 = sld [smem:[#allocation24_spill]] }
  0x13   :  { %s1828_s23 = scalar_lea.hbm %s2442_s2, 128 }
  0x14   :  { %p1829_p0 = scmp.ne.s32.totalorder %s2442_s2, %s1828_s23  ;;  %p1832_p1 = scmp.lt.u32.totalorder %s1828_s23, %s2442_s2 }
  0x16   :  { %p1834_p2 = pnand %p1832_p1, %p1829_p0 }
  0x18   :  { %1837 = shalt.err (!%p1834_p2)
}
  0x19   :  { %s1838_s27 = scalar_lea.vmem %s48_s30, 128  ;;  %p1843_p4 = scmp.lt.s32.totalorder %s48_s30, %s48_s30 }
  0x1a   :  { %p1839_p3 = scmp.ne.s32.totalorder %s48_s30, %s1838_s27  ;;  %p1844_p5 = scmp.lt.s32.totalorder %s1838_s27, %s1838_s27 }
  0x1c   :  { %p1845_p6 = por %p1844_p5, %p1843_p4 }
  0x1e   :  { %p1846_p7 = pnand %p1845_p6, %p1839_p3 }
  0x20   :  { %1849 = shalt.err (!%p1846_p7)
}
  0x21   :  { %s2040_s28 = smov 64   ;;  %s2041_s29 = smov 4  }
  0x22   :  { %53 = dma.hbm_to_vmem [thread:$0]  %s2442_s2, 128, %s48_s30, [#allocation6], %s2040_s28, %s2040_s28, %s2041_s29  }
  0x23   :  { %s1850_s23 = scalar_lea.hbm %s2418_s5, 1024 }
  0x24   :  { %p1851_p8 = scmp.ne.s32.totalorder %s2418_s5, %s1850_s23  ;;  %p1854_p9 = scmp.lt.u32.totalorder %s1850_s23, %s2418_s5 }
  0x26   :  { %p1856_p10 = pnand %p1854_p9, %p1851_p8 }
  0x28   :  { %1859 = shalt.err (!%p1856_p10)
}
  0x29   :  { %s1860_s27 = scalar_lea.vmem %s2153_s21, 1024  ;;  %p1865_p12 = scmp.lt.s32.totalorder %s2153_s21, %s2153_s21 }
  0x2a   :  { %p1861_p11 = scmp.ne.s32.totalorder %s2153_s21, %s1860_s27  ;;  %p1866_p13 = scmp.lt.s32.totalorder %s1860_s27, %s1860_s27 }
  0x2c   :  { %p1867_p0 = por %p1866_p13, %p1865_p12 }
  0x2e   :  { %p1868_p1 = pnand %p1867_p0, %p1861_p11 }
  0x30   :  { %1871 = shalt.err (!%p1868_p1)
}
  0x31   :  { %81 = dma.hbm_to_vmem [thread:$0]  %s2418_s5, 1024, %s2153_s21, [#allocation9], %s2040_s28, %s2040_s28, %s2041_s29  }
  0x32   :  { %s2042_s0 = smov [#allocation11]   ;;  %s2043_s1 = smov [#allocation2]  }
  0x33   :  { %s107_s20 = sshll.u32 %s2042_s0, 4  ;;  %s35_s22 = sshll.u32 %s2043_s1, 4  ;;  %s108_s20 = int_to_ptr.vmem [resolvable:$true] %s107_s20  ;;  %s2190_s22 = int_to_ptr.vmem [resolvable:$true] %s35_s22 }
  0x34   :  { %s1872_s25 = scalar_lea.hbm %s2424_s11, 1024 }
  0x35   :  { %p1873_p2 = scmp.ne.s32.totalorder %s2424_s11, %s1872_s25  ;;  %p1876_p3 = scmp.lt.u32.totalorder %s1872_s25, %s2424_s11 }
  0x37   :  { %p1878_p4 = pnand %p1876_p3, %p1873_p2 }
  0x39   :  { %1881 = shalt.err (!%p1878_p4)
}
  0x3a   :  { %s1882_s5 = scalar_lea.vmem %s108_s20, 1024  ;;  %p1887_p6 = scmp.lt.s32.totalorder %s108_s20, %s108_s20 }
  0x3b   :  { %p1883_p5 = scmp.ne.s32.totalorder %s108_s20, %s1882_s5  ;;  %p1888_p7 = scmp.lt.s32.totalorder %s1882_s5, %s1882_s5 }
  0x3d   :  { %p1889_p8 = por %p1888_p7, %p1887_p6 }
  0x3f   :  { %p1890_p9 = pnand %p1889_p8, %p1883_p5 }
  0x41   :  { %1893 = shalt.err (!%p1890_p9)
}
  0x42   :  { %113 = dma.hbm_to_vmem [thread:$0]  %s2424_s11, 1024, %s108_s20, [#allocation12], %s2040_s28, %s2040_s28, %s2041_s29  }
  0x43   :  { %s2443_s19 = sld [smem:[#allocation23_spill]] }
  0x49   :  { %s1894_s1 = scalar_lea.hbm %s2443_s19, 128 }
  0x4a   :  { %p1895_p10 = scmp.ne.s32.totalorder %s2443_s19, %s1894_s1  ;;  %p1898_p11 = scmp.lt.u32.totalorder %s1894_s1, %s2443_s19 }
  0x4c   :  { %p1900_p12 = pnand %p1898_p11, %p1895_p10 }
  0x4e   :  { %1903 = shalt.err (!%p1900_p12)
}
  0x4f   :  { %s1904_s26 = scalar_lea.vmem %s2190_s22, 128  ;;  %p1909_p0 = scmp.lt.s32.totalorder %s2190_s22, %s2190_s22 }
  0x50   :  { %p1905_p13 = scmp.ne.s32.totalorder %s2190_s22, %s1904_s26  ;;  %p1910_p1 = scmp.lt.s32.totalorder %s1904_s26, %s1904_s26 }
  0x52   :  { %p1911_p2 = por %p1910_p1, %p1909_p0 }
  0x54   :  { %p1912_p3 = pnand %p1911_p2, %p1905_p13 }
  0x56   :  { %1915 = shalt.err (!%p1912_p3)
}
  0x57   :  { %41 = dma.hbm_to_vmem [thread:$0]  %s2443_s19, 128, %s2190_s22, [#allocation3], %s2040_s28, %s2040_s28, %s2041_s29  }
  0x58   :  { %s2044_s27 = smov [#allocation7]   ;;  %s2045_s21 = smov [#allocation10]  }
  0x59   :  { %s61_s5 = sshll.u32 %s2044_s27, 4  ;;  %s93_s30 = sshll.u32 %s2045_s21, 4  ;;  %s62_s5 = int_to_ptr.vmem [resolvable:$true] %s61_s5  ;;  %s2227_s30 = int_to_ptr.vmem [resolvable:$true] %s93_s30 }
  0x5a   :  { %s2444_s1 = sld [smem:[#allocation26_spill]] }
  0x60   :  { %s1916_s23 = scalar_lea.hbm %s2444_s1, 1024 }
  0x61   :  { %p1917_p4 = scmp.ne.s32.totalorder %s2444_s1, %s1916_s23  ;;  %p1920_p5 = scmp.lt.u32.totalorder %s1916_s23, %s2444_s1 }
  0x63   :  { %p1922_p6 = pnand %p1920_p5, %p1917_p4 }
  0x65   :  { %1925 = shalt.err (!%p1922_p6)
}
  0x66   :  { %s1926_s22 = scalar_lea.vmem %s62_s5, 1024  ;;  %p1931_p8 = scmp.lt.s32.totalorder %s62_s5, %s62_s5 }
  0x67   :  { %p1927_p7 = scmp.ne.s32.totalorder %s62_s5, %s1926_s22  ;;  %p1932_p9 = scmp.lt.s32.totalorder %s1926_s22, %s1926_s22 }
  0x69   :  { %p1933_p10 = por %p1932_p9, %p1931_p8 }
  0x6b   :  { %p1934_p11 = pnand %p1933_p10, %p1927_p7 }
  0x6d   :  { %1937 = shalt.err (!%p1934_p11)
}
  0x6e   :  { %67 = dma.hbm_to_vmem [thread:$0]  %s2444_s1, 1024, %s62_s5, [#allocation6], %s2040_s28, %s2040_s28, %s2041_s29  }
  0x6f   :  { %s1938_s21 = scalar_lea.hbm %s2422_s9, 1024 }
  0x70   :  { %p1939_p12 = scmp.ne.s32.totalorder %s2422_s9, %s1938_s21  ;;  %p1942_p13 = scmp.lt.u32.totalorder %s1938_s21, %s2422_s9 }
  0x72   :  { %p1944_p0 = pnand %p1942_p13, %p1939_p12 }
  0x74   :  { %1947 = shalt.err (!%p1944_p0)
}
  0x75   :  { %s1948_s25 = scalar_lea.vmem %s2227_s30, 1024  ;;  %p1953_p2 = scmp.lt.s32.totalorder %s2227_s30, %s2227_s30 }
  0x76   :  { %p1949_p1 = scmp.ne.s32.totalorder %s2227_s30, %s1948_s25  ;;  %p1954_p3 = scmp.lt.s32.totalorder %s1948_s25, %s1948_s25 }
  0x78   :  { %p1955_p4 = por %p1954_p3, %p1953_p2 }
  0x7a   :  { %p1956_p5 = pnand %p1955_p4, %p1949_p1 }
  0x7c   :  { %1959 = shalt.err (!%p1956_p5)
}
  0x7d   :  { %99 = dma.hbm_to_vmem [thread:$0]  %s2422_s9, 1024, %s2227_s30, [#allocation9], %s2040_s28, %s2040_s28, %s2041_s29  }
  0x7e   :  { %s2046_s3 = smov [#allocation13]   ;;  %s1960_s11 = scalar_lea.hbm %s2428_s15, 4096 }
  0x7f   :  { %s125_s26 = sshll.u32 %s2046_s3, 4  ;;  %p1961_p6 = scmp.ne.s32.totalorder %s2428_s15, %s1960_s11  ;;  %s126_s26 = int_to_ptr.vmem [resolvable:$true] %s125_s26 }
  0x80   :  { %p1964_p7 = scmp.lt.u32.totalorder %s1960_s11, %s2428_s15 }
  0x82   :  { %p1966_p8 = pnand %p1964_p7, %p1961_p6 }
  0x84   :  { %1969 = shalt.err (!%p1966_p8)
}
  0x85   :  { %s1970_s0 = scalar_lea.vmem %s126_s26, 4096  ;;  %p1975_p10 = scmp.lt.s32.totalorder %s126_s26, %s126_s26 }
  0x86   :  { %p1971_p9 = scmp.ne.s32.totalorder %s126_s26, %s1970_s0  ;;  %p1976_p11 = scmp.lt.s32.totalorder %s1970_s0, %s1970_s0 }
  0x88   :  { %p1977_p12 = por %p1976_p11, %p1975_p10 }
  0x8a   :  { %p1978_p13 = pnand %p1977_p12, %p1971_p9 }
  0x8c   :  { %1981 = shalt.err (!%p1978_p13)
}
  0x8d   :  { %s2047_s9 = smov 128   ;;  %s2048_s28 = smov 8  }
  0x8e   :  { %131 = dma.hbm_to_vmem [thread:$0]  %s2428_s15, 4096, %s126_s26, [#allocation12], %s2047_s9, %s2047_s9, %s2048_s28  }
  0x8f   :  { %s2049_s23 = smov [#allocation14]   ;;  %s1982_s1 = scalar_lea.hbm %s2430_s17, 4096 }
  0x90   :  { %s139_s24 = sshll.u32 %s2049_s23, 4  ;;  %p1983_p0 = scmp.ne.s32.totalorder %s2430_s17, %s1982_s1  ;;  %s140_s24 = int_to_ptr.vmem [resolvable:$true] %s139_s24 }
  0x91   :  { %p1986_p1 = scmp.lt.u32.totalorder %s1982_s1, %s2430_s17 }
  0x93   :  { %p1988_p2 = pnand %p1986_p1, %p1983_p0 }
  0x95   :  { %1991 = shalt.err (!%p1988_p2)
}
  0x96   :  { %s1992_s20 = scalar_lea.vmem %s140_s24, 4096  ;;  %p1997_p4 = scmp.lt.s32.totalorder %s140_s24, %s140_s24 }
  0x97   :  { %p1993_p3 = scmp.ne.s32.totalorder %s140_s24, %s1992_s20  ;;  %p1998_p5 = scmp.lt.s32.totalorder %s1992_s20, %s1992_s20 }
  0x99   :  { %p1999_p6 = por %p1998_p5, %p1997_p4 }
  0x9b   :  { %p2000_p7 = pnand %p1999_p6, %p1993_p3 }
  0x9d   :  { %2003 = shalt.err (!%p2000_p7)
}
  0x9e   :  { %145 = dma.hbm_to_vmem [thread:$0]  %s2430_s17, 4096, %s140_s24, [#allocation15], %s2047_s9, %s2047_s9, %s2048_s28  }
  0x9f   :  { %2026 = dma.done.wait [#allocation3], 128  }
  0xa0   :  { %2027 = vsyncadd [#allocation3], 4294967168 }
  0xa1   :  { %2028 = dma.done.wait [#allocation6], 1152  }
  0xa2   :  { %2029 = vsyncadd [#allocation6], 4294966144 }
  0xa3   :  { %2030 = dma.done.wait [#allocation9], 2048  }
  0xa4   :  { %2031 = vsyncadd [#allocation9], 4294965248 }
  0xa5   :  { %2032 = dma.done.wait [#allocation12], 5120  }
  0xa6   :  { %2033 = vsyncadd [#allocation12], 4294962176 }
  0xa7   :  { %2034 = dma.done.wait [#allocation15], 4096  }
  0xa8   :  { %2035 = vsyncadd [#allocation15], 4294963200  ;;  %v2050_v0 = vmov 0.0   ;;  %vm2051_vm0 = vmmov 0   ;;  %v1694_v1 = vld [vmem:[#allocation5] sm:$0xff]   ;;  %v2294_v2 = vld [vmem:[#allocation2] sm:$0xff]  }
  0xa9   :  { %1575 = vmatprep.subr.bf16.mxu0 %v2050_v0  ;;  %1577 = vmatprep.mubr.msk.bf16.mxu0 %vm2051_vm0, %v2050_v0  ;;  %vm189_vm1 = vcmask 130048   ;;  %v1696_v3 = vld [vmem:[#allocation7] sm:$0xff]   ;;  %v1697_v4 = vld [vmem:[#allocation7 + $0x8] sm:$0xff]   ;;  %v1698_v5 = vld [vmem:[#allocation7 + $0x10] sm:$0xff]   ;;  %s2445_s29 = sld [smem:[#allocation25_spill]] }
  0xaa   :  { %1581 = vmatprep.subr.bf16.mxu1 %v2050_v0  ;;  %1597 = vmatprep.mubr.msk.bf16.mxu1 %vm2051_vm0, %v2050_v0  ;;  %v1699_v6 = vld [vmem:[#allocation7 + $0x18] sm:$0xff]   ;;  %v1700_v7 = vld [vmem:[#allocation7 + $0x20] sm:$0xff]   ;;  %v1701_v8 = vld [vmem:[#allocation7 + $0x28] sm:$0xff]  }
  0xab   :  { %1576 = vmatpush3.bf16.msra.mxu0 %v1694_v1  ;;  %1582 = vmatpush3.bf16.msra.mxu1 %v1696_v3  ;;  %v1702_v9 = vld [vmem:[#allocation7 + $0x30] sm:$0xff]   ;;  %v1703_v10 = vld [vmem:[#allocation7 + $0x38] sm:$0xff]   ;;  %v1704_v11 = vld [vmem:[#allocation8] sm:$0xff]   ;;  %v493_v3 = vlaneseq }
  0xac   :  { %1601 = vmatprep.subr.bf16.mxu0 %v2050_v0  ;;  %1583 = vmatprep.subr.bf16.mxu1 %v2050_v0  ;;  %v1705_v12 = vld [vmem:[#allocation8 + $0x8] sm:$0xff]   ;;  %v1706_v13 = vld [vmem:[#allocation8 + $0x10] sm:$0xff]   ;;  %v1707_v14 = vld [vmem:[#allocation8 + $0x18] sm:$0xff]  }
  0xad   :  { %v1708_v15 = vld [vmem:[#allocation8 + $0x20] sm:$0xff]   ;;  %v1709_v16 = vld [vmem:[#allocation8 + $0x28] sm:$0xff]   ;;  %v1710_v22 = vld [vmem:[#allocation8 + $0x30] sm:$0xff]  }
  0xae   :  { %1578 = vmatmul.mubr.msk.bf16.vlgmr.msra.gmra.mrb[0].mxu0 %vm189_vm1, %v2294_v2  ;;  %v1711_v23 = vld [vmem:[#allocation8 + $0x38] sm:$0xff]   ;;  %v1428_v24 = vld [vmem:[%s2417_s4] ss:$0 sm:$0xff] }
  0xaf   :  { %1617 = vmatprep.mubr.msk.bf16.mxu0 %vm2051_vm0, %v2050_v0  ;;  %1584 = vmatpush3.bf16.msra.mxu1 %v1697_v4  ;;  %v1437_v34 = vld [vmem:[%s2419_s6] ss:$0 sm:$0xff]  ;;  %v2327_v4 = vshrl.u32 %v493_v3, 7  ;;  %v1748_v3 = vld [vmem:[#allocation13 + $0x64] ss:$8 sps:$4 sm:$0xff]  }
  0xb0   :  { %1585 = vmatprep.subr.bf16.mxu1 %v2050_v0  ;;  %1602 = vmatpush3.bf16.msra.mxu0 %v1704_v11 }
  0xb1   :  { %1603 = vmatprep.subr.bf16.mxu0 %v2050_v0 }
  0xb3   :  { %1586 = vmatpush3.bf16.msra.mxu1 %v1698_v5  ;;  %v485_v5 = vld [vmem:[%s2420_s7] sm:$0x1] }
  0xb4   :  { %1587 = vmatprep.subr.bf16.mxu1 %v2050_v0  ;;  %1604 = vmatpush3.bf16.msra.mxu0 %v1705_v12 }
  0xb5   :  { %1605 = vmatprep.subr.bf16.mxu0 %v2050_v0 }
  0xb7   :  { %1588 = vmatpush3.bf16.msra.mxu1 %v1699_v6  ;;  %v2333_v6 = vsub.s32 0, %v2327_v4 }
  0xb8   :  { %1589 = vmatprep.subr.bf16.mxu1 %v2050_v0  ;;  %1606 = vmatpush3.bf16.msra.mxu0 %v1706_v13 }
  0xb9   :  { %1607 = vmatprep.subr.bf16.mxu0 %v2050_v0 }
  0xbb   :  { %1590 = vmatpush3.bf16.msra.mxu1 %v1700_v7 }
  0xbc   :  { %1591 = vmatprep.subr.bf16.mxu1 %v2050_v0  ;;  %1608 = vmatpush3.bf16.msra.mxu0 %v1707_v14 }
  0xbd   :  { %1609 = vmatprep.subr.bf16.mxu0 %v2050_v0 }
  0xbf   :  { %1592 = vmatpush3.bf16.msra.mxu1 %v1701_v8 }
  0xc0   :  { %1593 = vmatprep.subr.bf16.mxu1 %v2050_v0  ;;  %1610 = vmatpush3.bf16.msra.mxu0 %v1708_v15 }
  0xc1   :  { %1611 = vmatprep.subr.bf16.mxu0 %v2050_v0 }
  0xc3   :  { %1594 = vmatpush3.bf16.msra.mxu1 %v1702_v9  ;;  %v489_v9 = vld [vmem:[%s2421_s8] sm:$0x1] }
  0xc4   :  { %1595 = vmatprep.subr.bf16.mxu1 %v2050_v0  ;;  %1612 = vmatpush3.bf16.msra.mxu0 %v1709_v16 }
  0xc5   :  { %1613 = vmatprep.subr.bf16.mxu0 %v2050_v0 }
  0xc7   :  { %1596 = vmatpush3.bf16.msra.mxu1 %v1703_v10 }
  0xc8   :  { %1621 = vmatprep.subr.bf16.mxu1 %v2050_v0  ;;  %1614 = vmatpush3.bf16.msra.mxu0 %v1710_v22  ;;  %v1714_v22 = vld [vmem:[#allocation10 + $0x10] sm:$0xff]  }
  0xc9   :  { %1615 = vmatprep.subr.bf16.mxu0 %v2050_v0 }
  0xcc   :  { %1616 = vmatpush3.bf16.msra.mxu0 %v1711_v23  ;;  %v1715_v23 = vld [vmem:[#allocation10 + $0x18] sm:$0xff]  }
  0xcd   :  { %1627 = vmatprep.subr.bf16.mxu0 %v2050_v0 }
 0x181   :  { %v227_v17 = vpop.f32.mrb[0].mxu0 }
 0x182   :  { %v1579_v18 = vpop.f32.mrb[1].mxu0 }
 0x183   :  { %v230_v19 = vpop.f32.mrb[2].mxu0 }
 0x184   :  { %v234_v20 = vpack.c.bf16 %v230_v19, %v227_v17  ;;  %v1580_v21 = vpop.f32.mrb[3].mxu0  ;;  %v2343_v19 = vld [vmem:[%s2445_s29] sm:$0xf] }
 0x185   :  { %v1713_v21 = vld [vmem:[#allocation10 + $0x8] sm:$0xff]  }
 0x186   :  { %1598 = vmatmul.mubr.bf16.vlgmr.msra.gmra.mrb[0].mxu1 %v234_v20  ;;  %v1712_v20 = vld [vmem:[#allocation10] sm:$0xff]  }
 0x187   :  { %1623 = vmatprep.mubr.msk.bf16.mxu1 %vm2051_vm0, %v2050_v0 }
 0x259   :  { %v340_v25 = vpop.f32.mrb[0].mxu1 }
 0x25a   :  { %v341_v26 = vadd.f32 %v1428_v24, %v340_v25  ;;  %v1599_v27 = vpop.f32.mrb[1].mxu1  ;;  %v1718_v25 = vld [vmem:[#allocation10 + $0x30] sm:$0xff]  }
 0x25b   :  { %v343_v28 = vpop.f32.mrb[2].mxu1  ;;  %v1720_v27 = vld [vmem:[#allocation11] sm:$0xff]  }
 0x25c   :  { %v344_v29 = vadd.f32 %v1428_v24, %v343_v28  ;;  %v1600_v30 = vpop.f32.mrb[3].mxu1  ;;  %v347_v31 = vmax.f32 %v341_v26, 0.0  ;;  %v1717_v24 = vld [vmem:[#allocation10 + $0x28] sm:$0xff]   ;;  %v1719_v26 = vld [vmem:[#allocation10 + $0x38] sm:$0xff]  }
 0x25d   :  { %v1721_v28 = vld [vmem:[#allocation11 + $0x8] sm:$0xff]   ;;  %v1723_v30 = vld [vmem:[#allocation11 + $0x18] sm:$0xff]  }
 0x25e   :  { %v348_v32 = vmax.f32 %v344_v29, 0.0  ;;  %v1722_v29 = vld [vmem:[#allocation11 + $0x10] sm:$0xff]  }
 0x260   :  { %v349_v33 = vpack.c.bf16 %v348_v32, %v347_v31  ;;  %v1724_v31 = vld [vmem:[#allocation11 + $0x20] sm:$0xff]   ;;  %v1725_v32 = vld [vmem:[#allocation11 + $0x28] sm:$0xff]  }
 0x262   :  { %1618 = vmatmul.mubr.bf16.vlgmr.msra.gmra.mrb[4].mxu0 %v349_v33 }
 0x263   :  { %1629 = vmatprep.mubr.msk.bf16.mxu0 %vm2051_vm0, %v2050_v0 }
 0x335   :  { %v455_v35 = vpop.f32.mrb[4].mxu0 }
 0x336   :  { %v456_v36 = vadd.f32 %v1437_v34, %v455_v35  ;;  %v1619_v37 = vpop.f32.mrb[5].mxu0 }
 0x337   :  { %v458_v38 = vpop.f32.mrb[6].mxu0 }
 0x338   :  { %v462_v39 = vmax.f32 %v456_v36, 0.0  ;;  %v459_v40 = vadd.f32 %v1437_v34, %v458_v38  ;;  %v1620_v41 = vpop.f32.mrb[7].mxu0 }
 0x33a   :  { %v463_v42 = vmax.f32 %v459_v40, 0.0  ;;  %v472_v43 = vmul.f32 %v462_v39, %v462_v39 }
 0x33c   :  { %v464_v44 = vadd.f32 %v463_v42, %v462_v39  ;;  %v473_v45 = vmul.f32 %v463_v42, %v463_v42 }
 0x33e   :  { %v465_v46 = vrot.slane %v464_v44, 4  ;;  %v474_v47 = vadd.f32 %v473_v45, %v472_v43  ;;  %v1727_v43 = vld [vmem:[#allocation11 + $0x38] sm:$0xff]  }
 0x340   :  { %v466_v48 = vadd.f32 %v465_v46, %v464_v44  ;;  %v475_v49 = vrot.slane %v474_v47, 4  ;;  %v1448_v44 = vld [vmem:[%s2423_s10] ss:$0 sm:$0xff] }
 0x342   :  { %v467_v50 = vrot.slane %v466_v48, 2  ;;  %v476_v51 = vadd.f32 %v475_v49, %v474_v47 }
 0x344   :  { %v468_v52 = vadd.f32 %v467_v50, %v466_v48  ;;  %v477_v53 = vrot.slane %v476_v51, 2 }
 0x346   :  { %v469_v54 = vrot.slane %v468_v52, 1  ;;  %v478_v55 = vadd.f32 %v477_v53, %v476_v51 }
 0x348   :  { %v470_v56 = vadd.f32 %v469_v54, %v468_v52  ;;  %v479_v57 = vrot.slane %v478_v55, 1  ;;  %v1728_v54 = vld [vmem:[#allocation13] ss:$8 sps:$4 sm:$0xff]  }
 0x34a   :  { %v471_v58 = vmul.f32 0.0625, %v470_v56  ;;  %v480_v59 = vadd.f32 %v479_v57, %v478_v55  ;;  %v1730_v55 = vld [vmem:[#allocation13 + $0x4] ss:$8 sps:$4 sm:$0xff]   ;;  %v1733_v56 = vld [vmem:[#allocation13 + $0x14] ss:$8 sps:$4 sm:$0xff]  }
 0x34b   :  { %v1736_v57 = vld [vmem:[#allocation13 + $0x24] ss:$8 sps:$4 sm:$0xff]  }
 0x34c   :  { %v481_v60 = vmul.f32 0.0625, %v480_v59  ;;  %v482_v61 = vmul.f32 %v471_v58, %v471_v58  ;;  %v1739_v59 = vld [vmem:[#allocation13 + $0x34] ss:$8 sps:$4 sm:$0xff]  }
 0x34e   :  { %v483_v62 = vsub.f32 %v481_v60, %v482_v61  ;;  %v1737_v60 = vld [vmem:[#allocation13 + $0x30] ss:$8 sps:$4 sm:$0xff]   ;;  %v1742_v61 = vld [vmem:[#allocation13 + $0x44] ss:$8 sps:$4 sm:$0xff]  }
 0x350   :  { %v484_v63 = vmax.f32 %v483_v62, 0.0  ;;  %v1740_v62 = vld [vmem:[#allocation13 + $0x40] ss:$8 sps:$4 sm:$0xff]  }
 0x352   :  { %v486_v1 = vadd.f32 1e-05, %v484_v63  ;;  %v1745_v63 = vld [vmem:[#allocation13 + $0x54] ss:$8 sps:$4 sm:$0xff]  }
 0x354   :  { %1824 = vrsqrt.f32 %v486_v1  ;;  %v1743_v1 = vld [vmem:[#allocation13 + $0x50] ss:$8 sps:$4 sm:$0xff]  }
 0x35e   :  { %v1825_v7 = vpop.eup %1824 }
 0x35f   :  { %v488_v8 = vmul.f32 %v1825_v7, %v485_v5  ;;  %v1746_v5 = vld [vmem:[#allocation13 + $0x60] ss:$8 sps:$4 sm:$0xff]   ;;  %v1751_v7 = vld [vmem:[#allocation13 + $0x74] ss:$8 sps:$4 sm:$0xff]  }
 0x361   :  { %v490_v10 = vmul.f32 %v488_v8, %v471_v58  ;;  %v496_v11 = vrot.slane %v488_v8, %v2333_v6  ;;  %v1734_v58 = vld [vmem:[#allocation13 + $0x20] ss:$8 sps:$4 sm:$0xff]   ;;  %v1749_v8 = vld [vmem:[#allocation13 + $0x70] ss:$8 sps:$4 sm:$0xff]  }
 0x363   :  { %v491_v12 = vsub.f32 %v489_v9, %v490_v10  ;;  %v498_v13 = vmul.f32 %v496_v11, %v462_v39  ;;  %v499_v14 = vmul.f32 %v496_v11, %v463_v42  ;;  %v1726_v42 = vld [vmem:[#allocation11 + $0x30] sm:$0xff]   ;;  %v1754_v9 = vld [vmem:[#allocation13 + $0x84] ss:$8 sps:$4 sm:$0xff]   ;;  %v1752_v10 = vld [vmem:[#allocation13 + $0x80] ss:$8 sps:$4 sm:$0xff]  }
 0x364   :  { %v1757_v11 = vld [vmem:[#allocation13 + $0x94] ss:$8 sps:$4 sm:$0xff]  }
 0x365   :  { %v504_v15 = vrot.slane %v491_v12, %v2333_v6  ;;  %v1755_v12 = vld [vmem:[#allocation13 + $0x90] ss:$8 sps:$4 sm:$0xff]  }
 0x367   :  { %v507_v16 = vadd.f32 %v504_v15, %v499_v14  ;;  %v506_v17 = vadd.f32 %v504_v15, %v498_v13  ;;  %v1760_v13 = vld [vmem:[#allocation13 + $0xa4] ss:$8 sps:$4 sm:$0xff]   ;;  %v1758_v14 = vld [vmem:[#allocation13 + $0xa0] ss:$8 sps:$4 sm:$0xff]   ;;  %v1763_v15 = vld [vmem:[#allocation13 + $0xb4] ss:$8 sps:$4 sm:$0xff]  }
 0x369   :  { %v508_v18 = vpack.c.bf16 %v507_v16, %v506_v17  ;;  %v1761_v16 = vld [vmem:[#allocation13 + $0xb0] ss:$8 sps:$4 sm:$0xff]   ;;  %v1766_v17 = vld [vmem:[#allocation13 + $0xc4] ss:$8 sps:$4 sm:$0xff]  }
 0x36b   :  { %1622 = vmatpush3.bf16.msra.mxu1 %v508_v18  ;;  %1628 = vmatpush3.bf16.msra.mxu0 %v508_v18  ;;  %v1764_v18 = vld [vmem:[#allocation13 + $0xc0] ss:$8 sps:$4 sm:$0xff]  }
 0x36c   :  { %1633 = vmatprep.subr.bf16.mxu1 %v2050_v0  ;;  %1653 = vmatprep.subr.bf16.mxu0 %v2050_v0 }
 0x36e   :  { %1630 = vmatmul.mubr.msk.bf16.vlgmr.msra.gmra.mrb[8].mxu0 %vm189_vm1, %v2294_v2  ;;  %1624 = vmatmul.mubr.msk.bf16.vlgmr.msra.gmra.mrb[4].mxu1 %vm189_vm1, %v2343_v19  ;;  %v1716_v2 = vld [vmem:[#allocation10 + $0x20] sm:$0xff]  }
 0x36f   :  { %1634 = vmatpush3.bf16.msra.mxu1 %v1712_v20  ;;  %1649 = vmatprep.mubr.msk.bf16.mxu1 %vm2051_vm0, %v2050_v0  ;;  %v1769_v20 = vld [vmem:[#allocation13 + $0xd4] ss:$8 sps:$4 sm:$0xff]  }
 0x370   :  { %1635 = vmatprep.subr.bf16.mxu1 %v2050_v0  ;;  %1669 = vmatprep.mubr.msk.bf16.mxu0 %vm2051_vm0, %v2050_v0 }
 0x371   :  { %1654 = vmatpush3.bf16.msra.mxu0 %v1720_v27 }
 0x372   :  { %1655 = vmatprep.subr.bf16.mxu0 %v2050_v0 }
 0x373   :  { %1636 = vmatpush3.bf16.msra.mxu1 %v1713_v21  ;;  %v1767_v21 = vld [vmem:[#allocation13 + $0xd0] ss:$8 sps:$4 sm:$0xff]  }
 0x374   :  { %1637 = vmatprep.subr.bf16.mxu1 %v2050_v0 }
 0x375   :  { %1656 = vmatpush3.bf16.msra.mxu0 %v1721_v28 }
 0x376   :  { %1657 = vmatprep.subr.bf16.mxu0 %v2050_v0 }
 0x377   :  { %1638 = vmatpush3.bf16.msra.mxu1 %v1714_v22  ;;  %v1772_v22 = vld [vmem:[#allocation13 + $0xe4] ss:$8 sps:$4 sm:$0xff]  }
 0x378   :  { %1639 = vmatprep.subr.bf16.mxu1 %v2050_v0 }
 0x379   :  { %1658 = vmatpush3.bf16.msra.mxu0 %v1722_v29 }
 0x37a   :  { %1659 = vmatprep.subr.bf16.mxu0 %v2050_v0 }
 0x37b   :  { %1640 = vmatpush3.bf16.msra.mxu1 %v1715_v23  ;;  %v1770_v23 = vld [vmem:[#allocation13 + $0xe0] ss:$8 sps:$4 sm:$0xff]  }
 0x37c   :  { %1641 = vmatprep.subr.bf16.mxu1 %v2050_v0 }
 0x37d   :  { %1660 = vmatpush3.bf16.msra.mxu0 %v1723_v30 }
 0x37e   :  { %1661 = vmatprep.subr.bf16.mxu0 %v2050_v0 }
 0x37f   :  { %1642 = vmatpush3.bf16.msra.mxu1 %v1716_v2  ;;  %v1457_v2 = vld [vmem:[%s2425_s12] ss:$0 sm:$0xff] }
 0x380   :  { %1643 = vmatprep.subr.bf16.mxu1 %v2050_v0 }
 0x381   :  { %1662 = vmatpush3.bf16.msra.mxu0 %v1724_v31 }
 0x382   :  { %1663 = vmatprep.subr.bf16.mxu0 %v2050_v0 }
 0x383   :  { %1644 = vmatpush3.bf16.msra.mxu1 %v1717_v24 }
 0x384   :  { %1645 = vmatprep.subr.bf16.mxu1 %v2050_v0 }
 0x385   :  { %1664 = vmatpush3.bf16.msra.mxu0 %v1725_v32 }
 0x386   :  { %1665 = vmatprep.subr.bf16.mxu0 %v2050_v0 }
 0x387   :  { %1646 = vmatpush3.bf16.msra.mxu1 %v1718_v25 }
 0x388   :  { %1647 = vmatprep.subr.bf16.mxu1 %v2050_v0 }
 0x389   :  { %1666 = vmatpush3.bf16.msra.mxu0 %v1726_v42 }
 0x38a   :  { %1667 = vmatprep.subr.bf16.mxu0 %v2050_v0 }
 0x38b   :  { %1648 = vmatpush3.bf16.msra.mxu1 %v1719_v26 }
 0x38c   :  { %1673 = vmatprep.subr.bf16.mxu1 %v2050_v0 }
 0x38d   :  { %1668 = vmatpush3.bf16.msra.mxu0 %v1727_v43 }
 0x38e   :  { %1114 = vmatprep.subr.bf16.mxu0 %v1730_v55  ;;  %v844_v55 = vld [vmem:[%s2426_s13] sm:$0x1] }
 0x441   :  { %v586_v33 = vpop.f32.mrb[8].mxu0  ;;  %v2369_v34 = vpop.f32.mrb[4].mxu1 }
 0x442   :  { %v1631_v35 = vpop.f32.mrb[9].mxu0  ;;  %v1625_v36 = vpop.f32.mrb[5].mxu1 }
 0x443   :  { %v589_v37 = vpop.f32.mrb[10].mxu0  ;;  %v549_v38 = vpop.f32.mrb[6].mxu1 }
 0x444   :  { %v593_v39 = vpack.c.bf16 %v589_v37, %v586_v33  ;;  %v1632_v40 = vpop.f32.mrb[11].mxu0  ;;  %v1626_v41 = vpop.f32.mrb[7].mxu1 }
 0x446   :  { %1650 = vmatmul.mubr.bf16.vlgmr.msra.gmra.mrb[8].mxu1 %v593_v39 }
 0x447   :  { %1675 = vmatprep.mubr.msk.bf16.mxu1 %vm2051_vm0, %v2050_v0  ;;  %v1731_v0 = vld [vmem:[#allocation13 + $0x10] ss:$8 sps:$4 sm:$0xff]  }
 0x519   :  { %v699_v45 = vpop.f32.mrb[8].mxu1 }
 0x51a   :  { %v700_v46 = vadd.f32 %v1448_v44, %v699_v45  ;;  %v1651_v47 = vpop.f32.mrb[9].mxu1 }
 0x51b   :  { %v702_v48 = vpop.f32.mrb[10].mxu1 }
 0x51c   :  { %v703_v49 = vadd.f32 %v1448_v44, %v702_v48  ;;  %v1652_v50 = vpop.f32.mrb[11].mxu1  ;;  %v706_v51 = vmax.f32 %v700_v46, 0.0 }
 0x51e   :  { %v707_v52 = vmax.f32 %v703_v49, 0.0 }
 0x520   :  { %v708_v53 = vpack.c.bf16 %v707_v52, %v706_v51 }
 0x522   :  { %1670 = vmatmul.mubr.bf16.vlgmr.msra.gmra.mrb[12].mxu0 %v708_v53 }
 0x523   :  { %1115 = vmatpush1.bf16.msra.mxu0 %v1728_v54 }
 0x524   :  { %1116 = vmatprep.subr.bf16.mxu0 %v1733_v56 }
 0x527   :  { %1117 = vmatpush1.bf16.msra.mxu0 %v1731_v0 }
 0x528   :  { %1118 = vmatprep.subr.bf16.mxu0 %v1736_v57  ;;  %v848_v57 = vld [vmem:[%s2427_s14] sm:$0x1] }
 0x52b   :  { %1119 = vmatpush1.bf16.msra.mxu0 %v1734_v58 }
 0x52c   :  { %1120 = vmatprep.subr.bf16.mxu0 %v1739_v59 }
 0x52f   :  { %1121 = vmatpush1.bf16.msra.mxu0 %v1737_v60 }
 0x530   :  { %1122 = vmatprep.subr.bf16.mxu0 %v1742_v61 }
 0x533   :  { %1123 = vmatpush1.bf16.msra.mxu0 %v1740_v62 }
 0x534   :  { %1124 = vmatprep.subr.bf16.mxu0 %v1745_v63 }
 0x537   :  { %1125 = vmatpush1.bf16.msra.mxu0 %v1743_v1 }
 0x538   :  { %1126 = vmatprep.subr.bf16.mxu0 %v1748_v3 }
 0x53b   :  { %1127 = vmatpush1.bf16.msra.mxu0 %v1746_v5 }
 0x53c   :  { %1128 = vmatprep.subr.bf16.mxu0 %v1751_v7  ;;  %v1775_v7 = vld [vmem:[#allocation13 + $0xf4] ss:$8 sps:$4 sm:$0xff]  }
 0x53f   :  { %1129 = vmatpush1.bf16.msra.mxu0 %v1749_v8  ;;  %v1773_v8 = vld [vmem:[#allocation13 + $0xf0] ss:$8 sps:$4 sm:$0xff]  }
 0x540   :  { %1130 = vmatprep.subr.bf16.mxu0 %v1754_v9  ;;  %v1776_v9 = vld [vmem:[#allocation14] ss:$8 sps:$4 sm:$0xff]  }
 0x543   :  { %1131 = vmatpush1.bf16.msra.mxu0 %v1752_v10  ;;  %v1778_v10 = vld [vmem:[#allocation14 + $0x4] ss:$8 sps:$4 sm:$0xff]  }
 0x544   :  { %1132 = vmatprep.subr.bf16.mxu0 %v1757_v11  ;;  %v1781_v11 = vld [vmem:[#allocation14 + $0x14] ss:$8 sps:$4 sm:$0xff]  }
 0x547   :  { %1133 = vmatpush1.bf16.msra.mxu0 %v1755_v12  ;;  %v1779_v12 = vld [vmem:[#allocation14 + $0x10] ss:$8 sps:$4 sm:$0xff]  }
 0x548   :  { %1134 = vmatprep.subr.bf16.mxu0 %v1760_v13  ;;  %v1784_v13 = vld [vmem:[#allocation14 + $0x24] ss:$8 sps:$4 sm:$0xff]  }
 0x54b   :  { %1135 = vmatpush1.bf16.msra.mxu0 %v1758_v14  ;;  %v1782_v14 = vld [vmem:[#allocation14 + $0x20] ss:$8 sps:$4 sm:$0xff]  }
 0x54c   :  { %1136 = vmatprep.subr.bf16.mxu0 %v1763_v15  ;;  %v1787_v15 = vld [vmem:[#allocation14 + $0x34] ss:$8 sps:$4 sm:$0xff]  }
 0x54f   :  { %1137 = vmatpush1.bf16.msra.mxu0 %v1761_v16  ;;  %v1785_v16 = vld [vmem:[#allocation14 + $0x30] ss:$8 sps:$4 sm:$0xff]  }
 0x550   :  { %1138 = vmatprep.subr.bf16.mxu0 %v1766_v17  ;;  %v1788_v17 = vld [vmem:[#allocation14 + $0x40] ss:$8 sps:$4 sm:$0xff]  }
 0x553   :  { %1139 = vmatpush1.bf16.msra.mxu0 %v1764_v18  ;;  %v1793_v18 = vld [vmem:[#allocation14 + $0x54] ss:$8 sps:$4 sm:$0xff]  }
 0x554   :  { %1140 = vmatprep.subr.bf16.mxu0 %v1769_v20  ;;  %v1791_v20 = vld [vmem:[#allocation14 + $0x50] ss:$8 sps:$4 sm:$0xff]  }
 0x557   :  { %1141 = vmatpush1.bf16.msra.mxu0 %v1767_v21  ;;  %v1796_v21 = vld [vmem:[#allocation14 + $0x64] ss:$8 sps:$4 sm:$0xff]  }
 0x558   :  { %1142 = vmatprep.subr.bf16.mxu0 %v1772_v22  ;;  %v1794_v22 = vld [vmem:[#allocation14 + $0x60] ss:$8 sps:$4 sm:$0xff]  }
 0x55b   :  { %1143 = vmatpush1.bf16.msra.mxu0 %v1770_v23  ;;  %v1799_v23 = vld [vmem:[#allocation14 + $0x74] ss:$8 sps:$4 sm:$0xff]  }
 0x55c   :  { %1144 = vmatprep.subr.bf16.mxu0 %v1775_v7 }
 0x55f   :  { %1145 = vmatpush1.bf16.msra.mxu0 %v1773_v8 }
 0x5f5   :  { %v814_v24 = vpop.f32.mrb[12].mxu0 }
 0x5f6   :  { %v815_v25 = vadd.f32 %v1457_v2, %v814_v24  ;;  %v1671_v26 = vpop.f32.mrb[13].mxu0  ;;  %v1802_v24 = vld [vmem:[#allocation14 + $0x84] ss:$8 sps:$4 sm:$0xff]  }
 0x5f7   :  { %v817_v27 = vpop.f32.mrb[14].mxu0  ;;  %v1805_v26 = vld [vmem:[#allocation14 + $0x94] ss:$8 sps:$4 sm:$0xff]  }
 0x5f8   :  { %v821_v28 = vmax.f32 %v815_v25, 0.0  ;;  %v818_v29 = vadd.f32 %v1457_v2, %v817_v27  ;;  %v1672_v30 = vpop.f32.mrb[15].mxu0  ;;  %v1797_v2 = vld [vmem:[#allocation14 + $0x70] ss:$8 sps:$4 sm:$0xff]   ;;  %v1800_v25 = vld [vmem:[#allocation14 + $0x80] ss:$8 sps:$4 sm:$0xff]  }
 0x5f9   :  { %v1803_v27 = vld [vmem:[#allocation14 + $0x90] ss:$8 sps:$4 sm:$0xff]   ;;  %v1811_v30 = vld [vmem:[#allocation14 + $0xb4] ss:$8 sps:$4 sm:$0xff]  }
 0x5fa   :  { %v822_v31 = vmax.f32 %v818_v29, 0.0  ;;  %v831_v32 = vmul.f32 %v821_v28, %v821_v28  ;;  %v1806_v29 = vld [vmem:[#allocation14 + $0xa0] ss:$8 sps:$4 sm:$0xff]  }
 0x5fc   :  { %v823_v33 = vadd.f32 %v822_v31, %v821_v28  ;;  %v832_v35 = vmul.f32 %v822_v31, %v822_v31 }
 0x5fe   :  { %v824_v36 = vrot.slane %v823_v33, 4  ;;  %v833_v37 = vadd.f32 %v832_v35, %v831_v32  ;;  %v1814_v32 = vld [vmem:[#allocation14 + $0xc4] ss:$8 sps:$4 sm:$0xff]   ;;  %v1817_v35 = vld [vmem:[#allocation14 + $0xd4] ss:$8 sps:$4 sm:$0xff]  }
 0x600   :  { %v825_v38 = vadd.f32 %v824_v36, %v823_v33  ;;  %v834_v39 = vrot.slane %v833_v37, 4  ;;  %v1812_v33 = vld [vmem:[#allocation14 + $0xc0] ss:$8 sps:$4 sm:$0xff]   ;;  %v1815_v36 = vld [vmem:[#allocation14 + $0xd0] ss:$8 sps:$4 sm:$0xff]  }
 0x602   :  { %v826_v40 = vrot.slane %v825_v38, 2  ;;  %v835_v41 = vadd.f32 %v834_v39, %v833_v37 }
 0x604   :  { %v827_v42 = vadd.f32 %v826_v40, %v825_v38  ;;  %v836_v43 = vrot.slane %v835_v41, 2  ;;  %v908_v40 = vpack.c.bf16 %v2369_v34, %v2369_v34 }
 0x606   :  { %v828_v44 = vrot.slane %v827_v42, 1  ;;  %v837_v45 = vadd.f32 %v836_v43, %v835_v41  ;;  %v1820_v43 = vld [vmem:[#allocation14 + $0xe4] ss:$8 sps:$4 sm:$0xff]  }
 0x608   :  { %v829_v46 = vadd.f32 %v828_v44, %v827_v42  ;;  %v838_v47 = vrot.slane %v837_v45, 1  ;;  %v1818_v44 = vld [vmem:[#allocation14 + $0xe0] ss:$8 sps:$4 sm:$0xff]  }
 0x60a   :  { %v830_v48 = vmul.f32 0.0625, %v829_v46  ;;  %v839_v49 = vadd.f32 %v838_v47, %v837_v45  ;;  %v1823_v45 = vld [vmem:[#allocation14 + $0xf4] ss:$8 sps:$4 sm:$0xff]   ;;  %v1821_v46 = vld [vmem:[#allocation14 + $0xf0] ss:$8 sps:$4 sm:$0xff]  }
 0x60b   :  { %v942_v47 = vld [vmem:[%s2429_s16] sm:$0x3]  ;;  %s2052_s16 = smov [#allocation16]  }
 0x60c   :  { %v840_v50 = vmul.f32 0.0625, %v839_v49  ;;  %v841_v51 = vmul.f32 %v830_v48, %v830_v48  ;;  %v947_v34 = vrot.slane %v942_v47, %v2333_v6  ;;  %s1412_s22 = sshll.u32 %s2052_s16, 4  ;;  %s1413_s22 = int_to_ptr.vmem [resolvable:$true] %s1412_s22 }
 0x60d   :  { %s2004_s19 = scalar_lea.vmem %s1413_s22, 256  ;;  %p2009_p9 = scmp.lt.s32.totalorder %s1413_s22, %s1413_s22 }
 0x60e   :  { %v842_v52 = vsub.f32 %v840_v50, %v841_v51  ;;  %p2005_p8 = scmp.ne.s32.totalorder %s1413_s22, %s2004_s19  ;;  %p2010_p10 = scmp.lt.s32.totalorder %s2004_s19, %s2004_s19 }
 0x610   :  { %v843_v53 = vmax.f32 %v842_v52, 0.0  ;;  %p2011_p11 = por %p2010_p10, %p2009_p9 }
 0x612   :  { %v845_v54 = vadd.f32 1e-05, %v843_v53  ;;  %p2012_p12 = pnand %p2011_p11, %p2005_p8 }
 0x614   :  { %1826 = vrsqrt.f32 %v845_v54 }
 0x61e   :  { %v1827_v56 = vpop.eup %1826 }
 0x61f   :  { %v847_v0 = vmul.f32 %v1827_v56, %v844_v55 }
 0x621   :  { %v849_v58 = vmul.f32 %v847_v0, %v830_v48  ;;  %v855_v59 = vrot.slane %v847_v0, %v2333_v6  ;;  %v950_v48 = vsub.s32 1, %v2327_v4 }
 0x623   :  { %v850_v60 = vsub.f32 %v848_v57, %v849_v58  ;;  %v857_v61 = vmul.f32 %v855_v59, %v821_v28  ;;  %v858_v62 = vmul.f32 %v855_v59, %v822_v31  ;;  %v1808_v28 = vld [vmem:[#allocation14 + $0xa4] ss:$8 sps:$4 sm:$0xff]   ;;  %v1809_v31 = vld [vmem:[#allocation14 + $0xb0] ss:$8 sps:$4 sm:$0xff]   ;;  %v951_v49 = vrot.slane %v942_v47, %v950_v48 }
 0x624   :  { %v1191_v59 = vld [vmem:[%s2431_s18] sm:$0x3] }
 0x625   :  { %v863_v63 = vrot.slane %v850_v60, %v2333_v6  ;;  %v1196_v4 = vrot.slane %v1191_v59, %v2333_v6  ;;  %v1200_v60 = vrot.slane %v1191_v59, %v950_v48 }
 0x627   :  { %v866_v1 = vadd.f32 %v863_v63, %v858_v62  ;;  %v865_v3 = vadd.f32 %v863_v63, %v857_v61 }
 0x629   :  { %v867_v5 = vpack.c.bf16 %v866_v1, %v865_v3 }
 0x62b   :  { %1674 = vmatpush3.bf16.msra.mxu1 %v867_v5 }
 0x62c   :  { %1363 = vmatprep.subr.bf16.mxu1 %v1778_v10 }
 0x62e   :  { %1676 = vmatmul.mubr.msk.bf16.vlgmr.msra.gmra.mrb[12].mxu1 %vm189_vm1, %v2343_v19  ;;  %v1790_v19 = vld [vmem:[#allocation14 + $0x44] ss:$8 sps:$4 sm:$0xff]  }
 0x62f   :  { %1364 = vmatpush1.bf16.msra.mxu1 %v1776_v9 }
 0x630   :  { %1365 = vmatprep.subr.bf16.mxu1 %v1781_v11 }
 0x633   :  { %1366 = vmatpush1.bf16.msra.mxu1 %v1779_v12 }
 0x634   :  { %1367 = vmatprep.subr.bf16.mxu1 %v1784_v13 }
 0x637   :  { %1368 = vmatpush1.bf16.msra.mxu1 %v1782_v14 }
 0x638   :  { %1369 = vmatprep.subr.bf16.mxu1 %v1787_v15 }
 0x63b   :  { %1370 = vmatpush1.bf16.msra.mxu1 %v1785_v16 }
 0x63c   :  { %1371 = vmatprep.subr.bf16.mxu1 %v1790_v19 }
 0x63f   :  { %1372 = vmatpush1.bf16.msra.mxu1 %v1788_v17 }
 0x640   :  { %1373 = vmatprep.subr.bf16.mxu1 %v1793_v18 }
 0x643   :  { %1374 = vmatpush1.bf16.msra.mxu1 %v1791_v20 }
 0x644   :  { %1375 = vmatprep.subr.bf16.mxu1 %v1796_v21 }
 0x647   :  { %1376 = vmatpush1.bf16.msra.mxu1 %v1794_v22 }
 0x648   :  { %1377 = vmatprep.subr.bf16.mxu1 %v1799_v23 }
 0x64b   :  { %1378 = vmatpush1.bf16.msra.mxu1 %v1797_v2 }
 0x64c   :  { %1379 = vmatprep.subr.bf16.mxu1 %v1802_v24 }
 0x64f   :  { %1380 = vmatpush1.bf16.msra.mxu1 %v1800_v25 }
 0x650   :  { %1381 = vmatprep.subr.bf16.mxu1 %v1805_v26 }
 0x653   :  { %1382 = vmatpush1.bf16.msra.mxu1 %v1803_v27 }
 0x654   :  { %1383 = vmatprep.subr.bf16.mxu1 %v1808_v28 }
 0x657   :  { %1384 = vmatpush1.bf16.msra.mxu1 %v1806_v29 }
 0x658   :  { %1385 = vmatprep.subr.bf16.mxu1 %v1811_v30 }
 0x65b   :  { %1386 = vmatpush1.bf16.msra.mxu1 %v1809_v31 }
 0x65c   :  { %1387 = vmatprep.subr.bf16.mxu1 %v1814_v32 }
 0x65f   :  { %1388 = vmatpush1.bf16.msra.mxu1 %v1812_v33 }
 0x660   :  { %1389 = vmatprep.subr.bf16.mxu1 %v1817_v35 }
 0x663   :  { %1390 = vmatpush1.bf16.msra.mxu1 %v1815_v36 }
 0x664   :  { %1391 = vmatprep.subr.bf16.mxu1 %v1820_v43 }
 0x667   :  { %1392 = vmatpush1.bf16.msra.mxu1 %v1818_v44 }
 0x668   :  { %1393 = vmatprep.subr.bf16.mxu1 %v1823_v45 }
 0x66b   :  { %1394 = vmatpush1.bf16.msra.mxu1 %v1821_v46 }
 0x701   :  { %v902_v37 = vpop.f32.mrb[12].mxu1 }
 0x702   :  { %v909_v38 = vpack.c.bf16 %v902_v37, %v902_v37  ;;  %v1677_v39 = vpop.f32.mrb[13].mxu1 }
 0x703   :  { %v905_v41 = vpop.f32.mrb[14].mxu1 }
 0x704   :  { %1146 = vmatprep.mubr.bf16.mxu0 %v909_v38  ;;  %v1678_v42 = vpop.f32.mrb[15].mxu1 }
 0x705   :  { %1147 = vmatmul.mubr.bf16.vlgmr.msra.gmra.mrb[16].mxu0 %v908_v40 }
 0x7d8   :  { %v1148_v50 = vpop.f32.mrb[16].mxu0 }
 0x7d9   :  { %v1149_v51 = vadd.f32 %v1148_v50, %v947_v34  ;;  %v1150_v52 = vpop.f32.mrb[17].mxu0 }
 0x7da   :  { %v1151_v53 = vadd.f32 %v1150_v52, %v951_v49  ;;  %v1152_v54 = vpop.f32.mrb[18].mxu0 }
 0x7db   :  { %v1155_v55 = vmax.f32 %v1149_v51, 0.0  ;;  %v1153_v56 = vpop.f32.mrb[19].mxu0 }
 0x7dc   :  { %v1156_v0 = vmax.f32 %v1151_v53, 0.0 }
 0x7dd   :  { %v1157_v58 = vpack.c.bf16 %v1155_v55, %v1155_v55 }
 0x7de   :  { %v1158_v57 = vpack.c.bf16 %v1156_v0, %v1156_v0 }
 0x7e0   :  { %1395 = vmatprep.mubr.bf16.mxu1 %v1158_v57 }
 0x7e1   :  { %1396 = vmatmul.mubr.bf16.vlgmr.msra.gmra.mrb[16].mxu1 %v1157_v58 }
 0x8b4   :  { %v1397_v61 = vpop.f32.mrb[16].mxu1 }
 0x8b5   :  { %v1398_v62 = vadd.f32 %v1397_v61, %v1196_v4  ;;  %v1399_v63 = vpop.f32.mrb[17].mxu1 }
 0x8b6   :  { %v1400_v1 = vadd.f32 %v1399_v63, %v1200_v60  ;;  %v1401_v3 = vpop.f32.mrb[18].mxu1 }
 0x8b7   :  { %1404 = vst [vmem:[#allocation16] sm:$0xff] %v1398_v62  ;;  %v1402_v5 = vpop.f32.mrb[19].mxu1 }
 0x8b8   :  { %1405 = vst [vmem:[#allocation16 + $0x8] sm:$0xff] %v1400_v1 }
 0x8b9   :  { %2015 = shalt.err (!%p2012_p12)
}
 0x8ba   :  { %s2446_s20 = sld [smem:[#allocation27_spill]] }
 0x8c0   :  { %s2016_s15 = scalar_lea.hbm %s2446_s20, 256 }
 0x8c1   :  { %p2017_p13 = scmp.ne.s32.totalorder %s2446_s20, %s2016_s15  ;;  %p2020_p0 = scmp.lt.u32.totalorder %s2016_s15, %s2446_s20 }
 0x8c3   :  { %p2022_p1 = pnand %p2020_p0, %p2017_p13 }
 0x8c5   :  { %2025 = shalt.err (!%p2022_p1)
}
 0x8c6   :  { %1415 = dma.vmem_to_hbm [thread:$0]  %s1413_s22, 256, %s2446_s20, [#allocation4]  }
 0x8c7   :  { %2036 = dma.done.wait [#allocation4], 256  }
 0x8c8   :  { %2037 = vsyncadd [#allocation4], 4294967040 }
 0x8c9   :  { %1419 = vsyncpa [#allocation3], 1 }
 0x8ca   :  { %1420 = vsyncpa [#allocation6], 1 }
 0x8cb   :  { %1421 = vsyncpa [#allocation9], 1 }
 0x8cc   :  { %1422 = vsyncpa [#allocation12], 1 }
 0x8cd   :  { %1423 = vsyncpa [#allocation15], 1 }
 0x8ce   :  { %1424 = vsyncpa [#allocation4], 1 }

</bundles_post_ra>
